<compile_context>
chip_gen: v7x
topology: tpu7x:2x2x1
jax: 0.10.0
libtpu: 0.0.40
codegen_flags: <defaults>
</compile_context>

<pallas_src>
import functools

import jax
import jax.numpy as jnp
from jax.experimental import pallas as pl
from jax.experimental.pallas import tpu as pltpu

_LANES = 128


def _round_up(x, m):
    return (x + m - 1) // m * m


def bottleneck_group_kernel(x_ref, alpha_ref, w1_ref, b1_ref, w2_ref, b2_ref,
                            w3_ref, b3_ref, wf_ref, bf_ref, o_ref, pad_ref,
                            *, blocks, H, W):
    C, HW = x_ref.shape
    C4 = w1_ref.shape[1]
    OFF = _round_up(W + 1, _LANES)            # lane-aligned left halo offset
    PADL = pad_ref.shape[1]

    x = x_ref[...].astype(jnp.float32)        # (C, H*W), spatial on lanes

    # Zero only the halo borders; the interior is fully overwritten every block.
    pad_ref[:, 0:OFF] = jnp.zeros((C4, OFF), jnp.float32)
    pad_ref[:, OFF + HW:PADL] = jnp.zeros((C4, PADL - OFF - HW), jnp.float32)

    # Column-boundary masks for the 3x3 taps (row boundaries are handled by the
    # zero border of the padded scratch).  Computed once, reused by all blocks.
    col = jax.lax.broadcasted_iota(jnp.int32, (1, HW), 1) % W
    mask_l = (col != 0).astype(jnp.float32)        # tap needs x-1 >= 0
    mask_r = (col != W - 1).astype(jnp.float32)    # tap needs x+1 <  W

    y = x
    for blk in range(blocks):
        a1 = alpha_ref[2 * blk]                    # PReLU slopes (SMEM scalars)
        a2 = alpha_ref[2 * blk + 1]

        # ---- 1x1 conv C -> C4, PReLU:  (C4, C) @ (C, HW) ----
        h = jnp.dot(w1_ref[blk], y, preferred_element_type=jnp.float32)
        h = h + b1_ref[blk]
        h = jnp.where(h > 0, h, a1 * h)            # (C4, HW)

        # ---- 3x3 conv (padding=1) as 9 accumulated per-tap matmuls ----
        pad_ref[:, OFF:OFF + HW] = h               # lane-aligned interior write
        acc = jnp.zeros((C4, HW), jnp.float32)
        for dy in range(3):
            for dx in range(3):
                start = OFF + (dy - 1) * W + (dx - 1)
                t = pad_ref[:, start:start + HW]   # shifted tap, (C4, HW)
                if dx == 0:
                    t = t * mask_l
                elif dx == 2:
                    t = t * mask_r
                acc = acc + jnp.dot(w2_ref[blk, 3 * dy + dx], t,
                                    preferred_element_type=jnp.float32)
        h = acc + b2_ref[blk]
        h = jnp.where(h > 0, h, a2 * h)            # (C4, HW)

        # ---- 1x1 conv C4 -> C, plus Bottleneck residual ----
        y = y + jnp.dot(w3_ref[blk], h, preferred_element_type=jnp.float32) \
              + b3_ref[blk]

    # ---- trailing 1x1 conv (C -> C) and outer group residual ----
    yf = jnp.dot(wf_ref[...], y, preferred_element_type=jnp.float32) + bf_ref[...]
    o_ref[...] = (x + yf).astype(o_ref.dtype)


def bottleneck_group(x_nchw, params, blocks):
    N, C, H, W = x_nchw.shape
    C4 = C // 4
    HW = H * W
    OFF = _round_up(W + 1, _LANES)
    PADL = _round_up(OFF + HW + W + 1, _LANES)

    kernel = functools.partial(bottleneck_group_kernel, blocks=blocks, H=H, W=W)

    def full(shape):
        return pl.BlockSpec(shape, lambda b, _n=len(shape): (0,) * _n)

    x_flat = x_nchw.reshape(N, C, HW)      # NCHW -> (N, C, H*W): pure reshape

    # TODO(synk): for production sizes (H,W >= 256, nf >= 64) add a second grid
    # axis tiling H into row bands (1-row halo) for the v7x 64MiB VMEM budget /
    # pipeline depth, and cast MXU operands to bf16 on v6e/v7x.
    out_flat = pl.pallas_call(
        kernel,
        out_shape=jax.ShapeDtypeStruct((N, C, HW), x_nchw.dtype),
        grid=(N,),
        in_specs=[
            pl.BlockSpec((None, C, HW), lambda b: (b, 0, 0)),    # x (batch squeezed)
            pl.BlockSpec(memory_space=pltpu.MemorySpace.SMEM),   # PReLU slopes
            full((blocks, C4, C)),                               # w1
            full((blocks, C4, 1)),                               # b1
            full((blocks, 9, C4, C4)),                           # w2 (per-tap matrices)
            full((blocks, C4, 1)),                               # b2
            full((blocks, C, C4)),                               # w3
            full((blocks, C, 1)),                                # b3
            full((C, C)),                                        # wf (final 1x1)
            full((C, 1)),                                        # bf
        ],
        out_specs=pl.BlockSpec((None, C, HW), lambda b: (b, 0, 0)),
        scratch_shapes=[pltpu.VMEM((C4, PADL), jnp.float32)],
        compiler_params=pltpu.CompilerParams(
            dimension_semantics=("parallel",),
            vmem_limit_bytes=32 * 1024 * 1024,
        ),
    )(x_flat, params["alpha"], params["w1"], params["b1"], params["w2"],
      params["b2"], params["w3"], params["b3"], params["wf"], params["bf"])

    return out_flat.reshape(N, C, H, W)


# ---------------- deterministic parameter construction ----------------

def init_params_torch_convention(key, C, blocks, scale=0.1):
    """Raw weights in PyTorch Conv2d convention (out, in, kh, kw)."""
    C4 = C // 4
    raw = {"W1": [], "B1": [], "W2": [], "B2": [], "W3": [], "B3": []}
    for _ in range(blocks):
        key, *ks = jax.random.split(key, 7)
        raw["W1"].append(scale * jax.random.normal(ks[0], (C4, C, 1, 1), jnp.float32))
        raw["B1"].append(scale * jax.random.normal(ks[1], (C4,), jnp.float32))
        raw["W2"].append(scale * jax.random.normal(ks[2], (C4, C4, 3, 3), jnp.float32))
        raw["B2"].append(scale * jax.random.normal(ks[3], (C4,), jnp.float32))
        raw["W3"].append(scale * jax.random.normal(ks[4], (C, C4, 1, 1), jnp.float32))
        raw["B3"].append(scale * jax.random.normal(ks[5], (C,), jnp.float32))
    key, k1, k2 = jax.random.split(key, 3)
    raw["Wf"] = scale * jax.random.normal(k1, (C, C, 1, 1), jnp.float32)
    raw["Bf"] = scale * jax.random.normal(k2, (C,), jnp.float32)
    return {k: (jnp.stack(v) if isinstance(v, list) else v) for k, v in raw.items()}


def pack_params(raw, C, blocks):
    """Repack torch-convention weights for the (C, H*W) transposed-matmul kernel."""
    C4 = C // 4
    w1 = raw["W1"][:, :, :, 0, 0]                                     # (B, C4, C)
    b1 = raw["B1"][:, :, None]                                        # (B, C4, 1)
    # (B, C4o, C4i, 3, 3) -> (B, 3, 3, C4o, C4i) -> (B, 9, C4, C4): one matrix per tap.
    w2 = jnp.transpose(raw["W2"], (0, 3, 4, 1, 2)).reshape(blocks, 9, C4, C4)
    b2 = raw["B2"][:, :, None]                                        # (B, C4, 1)
    w3 = raw["W3"][:, :, :, 0, 0]                                     # (B, C, C4)
    b3 = raw["B3"][:, :, None]                                        # (B, C, 1)
    wf = raw["Wf"][:, :, 0, 0]                                        # (C, C)
    bf = raw["Bf"][:, None]                                           # (C, 1)
    alpha = jnp.full((2 * blocks,), 0.25, jnp.float32)                 # PReLU init (SMEM scalars)
    return dict(alpha=alpha, w1=w1, b1=b1, w2=w2, b2=b2, w3=w3, b3=b3, wf=wf, bf=bf)


# ---------------- pure-JAX reference (NCHW) for validation ----------------

def _conv_ref(x, w_oihw, b):
    pad = w_oihw.shape[2] // 2
    y = jax.lax.conv_general_dilated(
        x, w_oihw, window_strides=(1, 1), padding=[(pad, pad), (pad, pad)],
        dimension_numbers=("NCHW", "OIHW", "NCHW"),
        precision=jax.lax.Precision.HIGHEST)
    return y + b[None, :, None, None]


def group_ref(x, raw, blocks):
    y = x
    for i in range(blocks):
        h = _conv_ref(y, raw["W1"][i], raw["B1"][i])
        h = jnp.where(h > 0, h, 0.25 * h)
        h = _conv_ref(h, raw["W2"][i], raw["B2"][i])
        h = jnp.where(h > 0, h, 0.25 * h)
        h = _conv_ref(h, raw["W3"][i], raw["B3"][i])
        y = y + h
    return x + _conv_ref(y, raw["Wf"], raw["Bf"])


if __name__ == "__main__":
    N, C, H, W = 2, 16, 16, 16     # NCHW as PyTorch would see it (nf = 16, nf//4 = 4)
    blocks = 2

    key = jax.random.PRNGKey(0)
    kx, kw = jax.random.split(key)
    x_nchw = jax.random.normal(kx, (N, C, H, W), jnp.float32)

    raw = init_params_torch_convention(kw, C, blocks)
    params = pack_params(raw, C, blocks)

    out = bottleneck_group(x_nchw, params, blocks)
    out = jax.block_until_ready(out)

    ref = group_ref(x_nchw, raw, blocks)
    err = float(jnp.max(jnp.abs(out - ref)))
    assert out.shape == (N, C, H, W)
    assert err < 5e-4, f"max abs error vs reference: {err}"
    print("KERNEL_OK")
</pallas_src>

<mosaic_0001>
module attributes {stable_mosaic.version = 11 : i64} {
  func.func @bottleneck_group_kernel(%arg0: i32, %arg1: memref<1x16x256xf32, #tpu.memory_space<vmem>>, %arg2: memref<4xf32, #tpu.memory_space<smem>>, %arg3: memref<2x4x16xf32, #tpu.memory_space<vmem>>, %arg4: memref<2x4x1xf32, #tpu.memory_space<vmem>>, %arg5: memref<2x9x4x4xf32, #tpu.memory_space<vmem>>, %arg6: memref<2x4x1xf32, #tpu.memory_space<vmem>>, %arg7: memref<2x16x4xf32, #tpu.memory_space<vmem>>, %arg8: memref<2x16x1xf32, #tpu.memory_space<vmem>>, %arg9: memref<16x16xf32, #tpu.memory_space<vmem>>, %arg10: memref<16x1xf32, #tpu.memory_space<vmem>>, %arg11: memref<1x16x256xf32, #tpu.memory_space<vmem>>, %arg12: memref<4x512xf32, #tpu.memory_space<vmem>>) attributes {dimension_semantics = [#tpu.dimension_semantics<parallel>], iteration_bounds = array<i64: 2>, scalar_prefetch = 0 : i64, scratch_operands = 1 : i64, tpu.core_type = #tpu.core_type<tc>, window_params = [{transform_indices = @transform_0, window_bounds = array<i64: 1, 16, 256>}, {transform_indices = @transform_1, window_bounds = array<i64: 4>}, {pipeline_mode = #tpu.pipeline_mode<synchronous>, transform_indices = @transform_2, window_bounds = array<i64: 2, 4, 16>}, {pipeline_mode = #tpu.pipeline_mode<synchronous>, transform_indices = @transform_3, window_bounds = array<i64: 2, 4, 1>}, {pipeline_mode = #tpu.pipeline_mode<synchronous>, transform_indices = @transform_4, window_bounds = array<i64: 2, 9, 4, 4>}, {pipeline_mode = #tpu.pipeline_mode<synchronous>, transform_indices = @transform_5, window_bounds = array<i64: 2, 4, 1>}, {pipeline_mode = #tpu.pipeline_mode<synchronous>, transform_indices = @transform_6, window_bounds = array<i64: 2, 16, 4>}, {pipeline_mode = #tpu.pipeline_mode<synchronous>, transform_indices = @transform_7, window_bounds = array<i64: 2, 16, 1>}, {pipeline_mode = #tpu.pipeline_mode<synchronous>, transform_indices = @transform_8, window_bounds = array<i64: 16, 16>}, {pipeline_mode = #tpu.pipeline_mode<synchronous>, transform_indices = @transform_9, window_bounds = array<i64: 16, 1>}, {transform_indices = @transform_10, window_bounds = array<i64: 1, 16, 256>}]} {
    %c0 = arith.constant 0 : index
    %c0_0 = arith.constant 0 : index
    %c0_1 = arith.constant 0 : index
    %0 = vector.load %arg1[%c0, %c0_0, %c0_1] : memref<1x16x256xf32, #tpu.memory_space<vmem>>, vector<1x16x256xf32>
    %1 = vector.shape_cast %0 : vector<1x16x256xf32> to vector<16x256xf32>
    %cst = arith.constant 0.000000e+00 : f32
    %2 = vector.broadcast %cst : f32 to vector<4x128xf32>
    %c0_2 = arith.constant 0 : index
    %c0_3 = arith.constant 0 : index
    %3 = vector.load %arg12[%c0_2, %c0_3] : memref<4x512xf32, #tpu.memory_space<vmem>>, vector<4x128xf32>
    tpu.vector_store %arg12[%c0_2, %c0_3], %2 {strides = array<i32>} : memref<4x512xf32, #tpu.memory_space<vmem>>, vector<4x128xf32>,
    %cst_4 = arith.constant 0.000000e+00 : f32
    %4 = vector.broadcast %cst_4 : f32 to vector<4x128xf32>
    %c0_5 = arith.constant 0 : index
    %c384 = arith.constant 384 : index
    %5 = vector.load %arg12[%c0_5, %c384] : memref<4x512xf32, #tpu.memory_space<vmem>>, vector<4x128xf32>
    tpu.vector_store %arg12[%c0_5, %c384], %4 {strides = array<i32>} : memref<4x512xf32, #tpu.memory_space<vmem>>, vector<4x128xf32>,
    %6 = tpu.iota {dimensions = array<i32: 1>} : vector<1x256xi32>
    %c16_i32 = arith.constant 16 : i32
    %c0_i32 = arith.constant 0 : i32
    %7 = arith.cmpi eq, %c16_i32, %c0_i32 : i32
    %c1_i32 = arith.constant 1 : i32
    %8 = arith.select %7, %c1_i32, %c16_i32 : i32
    %9 = vector.broadcast %8 : i32 to vector<1x256xi32>
    %10 = arith.remsi %6, %9 : vector<1x256xi32>
    %c0_i32_6 = arith.constant 0 : i32
    %11 = vector.broadcast %c0_i32_6 : i32 to vector<1x256xi32>
    %12 = arith.cmpi ne, %10, %11 : vector<1x256xi32>
    %c0_i32_7 = arith.constant 0 : i32
    %13 = vector.broadcast %c0_i32_7 : i32 to vector<1x256xi32>
    %14 = arith.cmpi slt, %10, %13 : vector<1x256xi32>
    %c0_i32_8 = arith.constant 0 : i32
    %15 = arith.cmpi slt, %8, %c0_i32_8 : i32
    %16 = vector.broadcast %15 : i1 to vector<1x256xi1>
    %17 = vector.broadcast %16 : vector<1x256xi1> to vector<1x256xi1>
    %18 = arith.xori %14, %17 : vector<1x256xi1>
    %19 = arith.andi %18, %12 : vector<1x256xi1>
    %20 = vector.broadcast %8 : i32 to vector<1x256xi32>
    %21 = arith.addi %10, %20 : vector<1x256xi32>
    %22 = arith.select %19, %21, %10 : vector<1x256xi1>, vector<1x256xi32>
    %c0_i32_9 = arith.constant 0 : i32
    %23 = vector.broadcast %c0_i32_9 : i32 to vector<1x256xi32>
    %24 = arith.cmpi ne, %22, %23 : vector<1x256xi32>
    %25 = arith.extui %24 : vector<1x256xi1> to vector<1x256xi32>
    %26 = arith.sitofp %25 : vector<1x256xi32> to vector<1x256xf32>
    %c15_i32 = arith.constant 15 : i32
    %27 = vector.broadcast %c15_i32 : i32 to vector<1x256xi32>
    %28 = arith.cmpi ne, %22, %27 : vector<1x256xi32>
    %29 = arith.extui %28 : vector<1x256xi1> to vector<1x256xi32>
    %30 = arith.sitofp %29 : vector<1x256xi32> to vector<1x256xf32>
    %c0_10 = arith.constant 0 : index
    %31 = memref.load %arg2[%c0_10] : memref<4xf32, #tpu.memory_space<smem>>
    %c1 = arith.constant 1 : index
    %32 = memref.load %arg2[%c1] : memref<4xf32, #tpu.memory_space<smem>>
    %c0_11 = arith.constant 0 : index
    %c0_12 = arith.constant 0 : index
    %c0_13 = arith.constant 0 : index
    %33 = vector.load %arg3[%c0_11, %c0_12, %c0_13] : memref<2x4x16xf32, #tpu.memory_space<vmem>>, vector<1x4x16xf32>
    %34 = vector.shape_cast %33 : vector<1x4x16xf32> to vector<4x16xf32>
    %cst_14 = arith.constant dense<0.000000e+00> : vector<4x256xf32>
    %35 = tpu.matmul %34, %1, %cst_14 {dimension_numbers = #tpu.dot_dimension_numbers<[1], [0], [0], [1], [0, 0, 1, 1], [], []>} : vector<4x16xf32>, vector<16x256xf32>, vector<4x256xf32> -> vector<4x256xf32>
    %c0_15 = arith.constant 0 : index
    %c0_16 = arith.constant 0 : index
    %c0_17 = arith.constant 0 : index
    %36 = vector.load %arg4[%c0_15, %c0_16, %c0_17] : memref<2x4x1xf32, #tpu.memory_space<vmem>>, vector<1x4x1xf32>
    %37 = vector.shape_cast %36 : vector<1x4x1xf32> to vector<4x1xf32>
    %38 = vector.broadcast %37 : vector<4x1xf32> to vector<4x256xf32>
    %39 = arith.addf %35, %38 : vector<4x256xf32>
    %cst_18 = arith.constant 0.000000e+00 : f32
    %40 = vector.broadcast %cst_18 : f32 to vector<4x256xf32>
    %41 = arith.cmpf ogt, %39, %40 : vector<4x256xf32>
    %42 = vector.broadcast %31 : f32 to vector<4x256xf32>
    %43 = arith.mulf %42, %39 : vector<4x256xf32>
    %44 = arith.select %41, %39, %43 : vector<4x256xi1>, vector<4x256xf32>
    %c0_19 = arith.constant 0 : index
    %c128 = arith.constant 128 : index
    %45 = vector.load %arg12[%c0_19, %c128] : memref<4x512xf32, #tpu.memory_space<vmem>>, vector<4x256xf32>
    tpu.vector_store %arg12[%c0_19, %c128], %44 {strides = array<i32>} : memref<4x512xf32, #tpu.memory_space<vmem>>, vector<4x256xf32>,
    %cst_20 = arith.constant 0.000000e+00 : f32
    %46 = vector.broadcast %cst_20 : f32 to vector<4x256xf32>
    %c0_21 = arith.constant 0 : index
    %c111 = arith.constant 111 : index
    %47 = vector.load %arg12[%c0_21, %c111] : memref<4x512xf32, #tpu.memory_space<vmem>>, vector<4x256xf32>
    %48 = vector.broadcast %26 : vector<1x256xf32> to vector<4x256xf32>
    %49 = arith.mulf %47, %48 : vector<4x256xf32>
    %c0_22 = arith.constant 0 : index
    %c0_23 = arith.constant 0 : index
    %c0_24 = arith.constant 0 : index
    %c0_25 = arith.constant 0 : index
    %50 = vector.load %arg5[%c0_22, %c0_23, %c0_24, %c0_25] : memref<2x9x4x4xf32, #tpu.memory_space<vmem>>, vector<1x1x4x4xf32>
    %51 = vector.shape_cast %50 : vector<1x1x4x4xf32> to vector<4x4xf32>
    %cst_26 = arith.constant dense<0.000000e+00> : vector<4x256xf32>
    %52 = tpu.matmul %51, %49, %cst_26 {dimension_numbers = #tpu.dot_dimension_numbers<[1], [0], [0], [1], [0, 0, 1, 1], [], []>} : vector<4x4xf32>, vector<4x256xf32>, vector<4x256xf32> -> vector<4x256xf32>
    %53 = arith.addf %46, %52 : vector<4x256xf32>
    %c0_27 = arith.constant 0 : index
    %c112 = arith.constant 112 : index
    %54 = vector.load %arg12[%c0_27, %c112] : memref<4x512xf32, #tpu.memory_space<vmem>>, vector<4x256xf32>
    %c0_28 = arith.constant 0 : index
    %c1_29 = arith.constant 1 : index
    %c0_30 = arith.constant 0 : index
    %c0_31 = arith.constant 0 : index
    %55 = vector.load %arg5[%c0_28, %c1_29, %c0_30, %c0_31] : memref<2x9x4x4xf32, #tpu.memory_space<vmem>>, vector<1x1x4x4xf32>
    %56 = vector.shape_cast %55 : vector<1x1x4x4xf32> to vector<4x4xf32>
    %cst_32 = arith.constant dense<0.000000e+00> : vector<4x256xf32>
    %57 = tpu.matmul %56, %54, %cst_32 {dimension_numbers = #tpu.dot_dimension_numbers<[1], [0], [0], [1], [0, 0, 1, 1], [], []>} : vector<4x4xf32>, vector<4x256xf32>, vector<4x256xf32> -> vector<4x256xf32>
    %58 = arith.addf %53, %57 : vector<4x256xf32>
    %c0_33 = arith.constant 0 : index
    %c113 = arith.constant 113 : index
    %59 = vector.load %arg12[%c0_33, %c113] : memref<4x512xf32, #tpu.memory_space<vmem>>, vector<4x256xf32>
    %60 = vector.broadcast %30 : vector<1x256xf32> to vector<4x256xf32>
    %61 = arith.mulf %59, %60 : vector<4x256xf32>
    %c0_34 = arith.constant 0 : index
    %c2 = arith.constant 2 : index
    %c0_35 = arith.constant 0 : index
    %c0_36 = arith.constant 0 : index
    %62 = vector.load %arg5[%c0_34, %c2, %c0_35, %c0_36] : memref<2x9x4x4xf32, #tpu.memory_space<vmem>>, vector<1x1x4x4xf32>
    %63 = vector.shape_cast %62 : vector<1x1x4x4xf32> to vector<4x4xf32>
    %cst_37 = arith.constant dense<0.000000e+00> : vector<4x256xf32>
    %64 = tpu.matmul %63, %61, %cst_37 {dimension_numbers = #tpu.dot_dimension_numbers<[1], [0], [0], [1], [0, 0, 1, 1], [], []>} : vector<4x4xf32>, vector<4x256xf32>, vector<4x256xf32> -> vector<4x256xf32>
    %65 = arith.addf %58, %64 : vector<4x256xf32>
    %c0_38 = arith.constant 0 : index
    %c127 = arith.constant 127 : index
    %66 = vector.load %arg12[%c0_38, %c127] : memref<4x512xf32, #tpu.memory_space<vmem>>, vector<4x256xf32>
    %67 = vector.broadcast %26 : vector<1x256xf32> to vector<4x256xf32>
    %68 = arith.mulf %66, %67 : vector<4x256xf32>
    %c0_39 = arith.constant 0 : index
    %c3 = arith.constant 3 : index
    %c0_40 = arith.constant 0 : index
    %c0_41 = arith.constant 0 : index
    %69 = vector.load %arg5[%c0_39, %c3, %c0_40, %c0_41] : memref<2x9x4x4xf32, #tpu.memory_space<vmem>>, vector<1x1x4x4xf32>
    %70 = vector.shape_cast %69 : vector<1x1x4x4xf32> to vector<4x4xf32>
    %cst_42 = arith.constant dense<0.000000e+00> : vector<4x256xf32>
    %71 = tpu.matmul %70, %68, %cst_42 {dimension_numbers = #tpu.dot_dimension_numbers<[1], [0], [0], [1], [0, 0, 1, 1], [], []>} : vector<4x4xf32>, vector<4x256xf32>, vector<4x256xf32> -> vector<4x256xf32>
    %72 = arith.addf %65, %71 : vector<4x256xf32>
    %c0_43 = arith.constant 0 : index
    %c128_44 = arith.constant 128 : index
    %73 = vector.load %arg12[%c0_43, %c128_44] : memref<4x512xf32, #tpu.memory_space<vmem>>, vector<4x256xf32>
    %c0_45 = arith.constant 0 : index
    %c4 = arith.constant 4 : index
    %c0_46 = arith.constant 0 : index
    %c0_47 = arith.constant 0 : index
    %74 = vector.load %arg5[%c0_45, %c4, %c0_46, %c0_47] : memref<2x9x4x4xf32, #tpu.memory_space<vmem>>, vector<1x1x4x4xf32>
    %75 = vector.shape_cast %74 : vector<1x1x4x4xf32> to vector<4x4xf32>
    %cst_48 = arith.constant dense<0.000000e+00> : vector<4x256xf32>
    %76 = tpu.matmul %75, %73, %cst_48 {dimension_numbers = #tpu.dot_dimension_numbers<[1], [0], [0], [1], [0, 0, 1, 1], [], []>} : vector<4x4xf32>, vector<4x256xf32>, vector<4x256xf32> -> vector<4x256xf32>
    %77 = arith.addf %72, %76 : vector<4x256xf32>
    %c0_49 = arith.constant 0 : index
    %c129 = arith.constant 129 : index
    %78 = vector.load %arg12[%c0_49, %c129] : memref<4x512xf32, #tpu.memory_space<vmem>>, vector<4x256xf32>
    %79 = vector.broadcast %30 : vector<1x256xf32> to vector<4x256xf32>
    %80 = arith.mulf %78, %79 : vector<4x256xf32>
    %c0_50 = arith.constant 0 : index
    %c5 = arith.constant 5 : index
    %c0_51 = arith.constant 0 : index
    %c0_52 = arith.constant 0 : index
    %81 = vector.load %arg5[%c0_50, %c5, %c0_51, %c0_52] : memref<2x9x4x4xf32, #tpu.memory_space<vmem>>, vector<1x1x4x4xf32>
    %82 = vector.shape_cast %81 : vector<1x1x4x4xf32> to vector<4x4xf32>
    %cst_53 = arith.constant dense<0.000000e+00> : vector<4x256xf32>
    %83 = tpu.matmul %82, %80, %cst_53 {dimension_numbers = #tpu.dot_dimension_numbers<[1], [0], [0], [1], [0, 0, 1, 1], [], []>} : vector<4x4xf32>, vector<4x256xf32>, vector<4x256xf32> -> vector<4x256xf32>
    %84 = arith.addf %77, %83 : vector<4x256xf32>
    %c0_54 = arith.constant 0 : index
    %c143 = arith.constant 143 : index
    %85 = vector.load %arg12[%c0_54, %c143] : memref<4x512xf32, #tpu.memory_space<vmem>>, vector<4x256xf32>
    %86 = vector.broadcast %26 : vector<1x256xf32> to vector<4x256xf32>
    %87 = arith.mulf %85, %86 : vector<4x256xf32>
    %c0_55 = arith.constant 0 : index
    %c6 = arith.constant 6 : index
    %c0_56 = arith.constant 0 : index
    %c0_57 = arith.constant 0 : index
    %88 = vector.load %arg5[%c0_55, %c6, %c0_56, %c0_57] : memref<2x9x4x4xf32, #tpu.memory_space<vmem>>, vector<1x1x4x4xf32>
    %89 = vector.shape_cast %88 : vector<1x1x4x4xf32> to vector<4x4xf32>
    %cst_58 = arith.constant dense<0.000000e+00> : vector<4x256xf32>
    %90 = tpu.matmul %89, %87, %cst_58 {dimension_numbers = #tpu.dot_dimension_numbers<[1], [0], [0], [1], [0, 0, 1, 1], [], []>} : vector<4x4xf32>, vector<4x256xf32>, vector<4x256xf32> -> vector<4x256xf32>
    %91 = arith.addf %84, %90 : vector<4x256xf32>
    %c0_59 = arith.constant 0 : index
    %c144 = arith.constant 144 : index
    %92 = vector.load %arg12[%c0_59, %c144] : memref<4x512xf32, #tpu.memory_space<vmem>>, vector<4x256xf32>
    %c0_60 = arith.constant 0 : index
    %c7 = arith.constant 7 : index
    %c0_61 = arith.constant 0 : index
    %c0_62 = arith.constant 0 : index
    %93 = vector.load %arg5[%c0_60, %c7, %c0_61, %c0_62] : memref<2x9x4x4xf32, #tpu.memory_space<vmem>>, vector<1x1x4x4xf32>
    %94 = vector.shape_cast %93 : vector<1x1x4x4xf32> to vector<4x4xf32>
    %cst_63 = arith.constant dense<0.000000e+00> : vector<4x256xf32>
    %95 = tpu.matmul %94, %92, %cst_63 {dimension_numbers = #tpu.dot_dimension_numbers<[1], [0], [0], [1], [0, 0, 1, 1], [], []>} : vector<4x4xf32>, vector<4x256xf32>, vector<4x256xf32> -> vector<4x256xf32>
    %96 = arith.addf %91, %95 : vector<4x256xf32>
    %c0_64 = arith.constant 0 : index
    %c145 = arith.constant 145 : index
    %97 = vector.load %arg12[%c0_64, %c145] : memref<4x512xf32, #tpu.memory_space<vmem>>, vector<4x256xf32>
    %98 = vector.broadcast %30 : vector<1x256xf32> to vector<4x256xf32>
    %99 = arith.mulf %97, %98 : vector<4x256xf32>
    %c0_65 = arith.constant 0 : index
    %c8 = arith.constant 8 : index
    %c0_66 = arith.constant 0 : index
    %c0_67 = arith.constant 0 : index
    %100 = vector.load %arg5[%c0_65, %c8, %c0_66, %c0_67] : memref<2x9x4x4xf32, #tpu.memory_space<vmem>>, vector<1x1x4x4xf32>
    %101 = vector.shape_cast %100 : vector<1x1x4x4xf32> to vector<4x4xf32>
    %cst_68 = arith.constant dense<0.000000e+00> : vector<4x256xf32>
    %102 = tpu.matmul %101, %99, %cst_68 {dimension_numbers = #tpu.dot_dimension_numbers<[1], [0], [0], [1], [0, 0, 1, 1], [], []>} : vector<4x4xf32>, vector<4x256xf32>, vector<4x256xf32> -> vector<4x256xf32>
    %103 = arith.addf %96, %102 : vector<4x256xf32>
    %c0_69 = arith.constant 0 : index
    %c0_70 = arith.constant 0 : index
    %c0_71 = arith.constant 0 : index
    %104 = vector.load %arg6[%c0_69, %c0_70, %c0_71] : memref<2x4x1xf32, #tpu.memory_space<vmem>>, vector<1x4x1xf32>
    %105 = vector.shape_cast %104 : vector<1x4x1xf32> to vector<4x1xf32>
    %106 = vector.broadcast %105 : vector<4x1xf32> to vector<4x256xf32>
    %107 = arith.addf %103, %106 : vector<4x256xf32>
    %cst_72 = arith.constant 0.000000e+00 : f32
    %108 = vector.broadcast %cst_72 : f32 to vector<4x256xf32>
    %109 = arith.cmpf ogt, %107, %108 : vector<4x256xf32>
    %110 = vector.broadcast %32 : f32 to vector<4x256xf32>
    %111 = arith.mulf %110, %107 : vector<4x256xf32>
    %112 = arith.select %109, %107, %111 : vector<4x256xi1>, vector<4x256xf32>
    %c0_73 = arith.constant 0 : index
    %c0_74 = arith.constant 0 : index
    %c0_75 = arith.constant 0 : index
    %113 = vector.load %arg7[%c0_73, %c0_74, %c0_75] : memref<2x16x4xf32, #tpu.memory_space<vmem>>, vector<1x16x4xf32>
    %114 = vector.shape_cast %113 : vector<1x16x4xf32> to vector<16x4xf32>
    %cst_76 = arith.constant dense<0.000000e+00> : vector<16x256xf32>
    %115 = tpu.matmul %114, %112, %cst_76 {dimension_numbers = #tpu.dot_dimension_numbers<[1], [0], [0], [1], [0, 0, 1, 1], [], []>} : vector<16x4xf32>, vector<4x256xf32>, vector<16x256xf32> -> vector<16x256xf32>
    %116 = arith.addf %1, %115 : vector<16x256xf32>
    %c0_77 = arith.constant 0 : index
    %c0_78 = arith.constant 0 : index
    %c0_79 = arith.constant 0 : index
    %117 = vector.load %arg8[%c0_77, %c0_78, %c0_79] : memref<2x16x1xf32, #tpu.memory_space<vmem>>, vector<1x16x1xf32>
    %118 = vector.shape_cast %117 : vector<1x16x1xf32> to vector<16x1xf32>
    %119 = vector.broadcast %118 : vector<16x1xf32> to vector<16x256xf32>
    %120 = arith.addf %116, %119 : vector<16x256xf32>
    %c2_80 = arith.constant 2 : index
    %121 = memref.load %arg2[%c2_80] : memref<4xf32, #tpu.memory_space<smem>>
    %c3_81 = arith.constant 3 : index
    %122 = memref.load %arg2[%c3_81] : memref<4xf32, #tpu.memory_space<smem>>
    %c1_82 = arith.constant 1 : index
    %c0_83 = arith.constant 0 : index
    %c0_84 = arith.constant 0 : index
    %123 = vector.load %arg3[%c1_82, %c0_83, %c0_84] : memref<2x4x16xf32, #tpu.memory_space<vmem>>, vector<1x4x16xf32>
    %124 = vector.shape_cast %123 : vector<1x4x16xf32> to vector<4x16xf32>
    %cst_85 = arith.constant dense<0.000000e+00> : vector<4x256xf32>
    %125 = tpu.matmul %124, %120, %cst_85 {dimension_numbers = #tpu.dot_dimension_numbers<[1], [0], [0], [1], [0, 0, 1, 1], [], []>} : vector<4x16xf32>, vector<16x256xf32>, vector<4x256xf32> -> vector<4x256xf32>
    %c1_86 = arith.constant 1 : index
    %c0_87 = arith.constant 0 : index
    %c0_88 = arith.constant 0 : index
    %126 = vector.load %arg4[%c1_86, %c0_87, %c0_88] : memref<2x4x1xf32, #tpu.memory_space<vmem>>, vector<1x4x1xf32>
    %127 = vector.shape_cast %126 : vector<1x4x1xf32> to vector<4x1xf32>
    %128 = vector.broadcast %127 : vector<4x1xf32> to vector<4x256xf32>
    %129 = arith.addf %125, %128 : vector<4x256xf32>
    %cst_89 = arith.constant 0.000000e+00 : f32
    %130 = vector.broadcast %cst_89 : f32 to vector<4x256xf32>
    %131 = arith.cmpf ogt, %129, %130 : vector<4x256xf32>
    %132 = vector.broadcast %121 : f32 to vector<4x256xf32>
    %133 = arith.mulf %132, %129 : vector<4x256xf32>
    %134 = arith.select %131, %129, %133 : vector<4x256xi1>, vector<4x256xf32>
    %c0_90 = arith.constant 0 : index
    %c128_91 = arith.constant 128 : index
    %135 = vector.load %arg12[%c0_90, %c128_91] : memref<4x512xf32, #tpu.memory_space<vmem>>, vector<4x256xf32>
    tpu.vector_store %arg12[%c0_90, %c128_91], %134 {strides = array<i32>} : memref<4x512xf32, #tpu.memory_space<vmem>>, vector<4x256xf32>,
    %cst_92 = arith.constant 0.000000e+00 : f32
    %136 = vector.broadcast %cst_92 : f32 to vector<4x256xf32>
    %c0_93 = arith.constant 0 : index
    %c111_94 = arith.constant 111 : index
    %137 = vector.load %arg12[%c0_93, %c111_94] : memref<4x512xf32, #tpu.memory_space<vmem>>, vector<4x256xf32>
    %138 = vector.broadcast %26 : vector<1x256xf32> to vector<4x256xf32>
    %139 = arith.mulf %137, %138 : vector<4x256xf32>
    %c1_95 = arith.constant 1 : index
    %c0_96 = arith.constant 0 : index
    %c0_97 = arith.constant 0 : index
    %c0_98 = arith.constant 0 : index
    %140 = vector.load %arg5[%c1_95, %c0_96, %c0_97, %c0_98] : memref<2x9x4x4xf32, #tpu.memory_space<vmem>>, vector<1x1x4x4xf32>
    %141 = vector.shape_cast %140 : vector<1x1x4x4xf32> to vector<4x4xf32>
    %cst_99 = arith.constant dense<0.000000e+00> : vector<4x256xf32>
    %142 = tpu.matmul %141, %139, %cst_99 {dimension_numbers = #tpu.dot_dimension_numbers<[1], [0], [0], [1], [0, 0, 1, 1], [], []>} : vector<4x4xf32>, vector<4x256xf32>, vector<4x256xf32> -> vector<4x256xf32>
    %143 = arith.addf %136, %142 : vector<4x256xf32>
    %c0_100 = arith.constant 0 : index
    %c112_101 = arith.constant 112 : index
    %144 = vector.load %arg12[%c0_100, %c112_101] : memref<4x512xf32, #tpu.memory_space<vmem>>, vector<4x256xf32>
    %c1_102 = arith.constant 1 : index
    %c1_103 = arith.constant 1 : index
    %c0_104 = arith.constant 0 : index
    %c0_105 = arith.constant 0 : index
    %145 = vector.load %arg5[%c1_102, %c1_103, %c0_104, %c0_105] : memref<2x9x4x4xf32, #tpu.memory_space<vmem>>, vector<1x1x4x4xf32>
    %146 = vector.shape_cast %145 : vector<1x1x4x4xf32> to vector<4x4xf32>
    %cst_106 = arith.constant dense<0.000000e+00> : vector<4x256xf32>
    %147 = tpu.matmul %146, %144, %cst_106 {dimension_numbers = #tpu.dot_dimension_numbers<[1], [0], [0], [1], [0, 0, 1, 1], [], []>} : vector<4x4xf32>, vector<4x256xf32>, vector<4x256xf32> -> vector<4x256xf32>
    %148 = arith.addf %143, %147 : vector<4x256xf32>
    %c0_107 = arith.constant 0 : index
    %c113_108 = arith.constant 113 : index
    %149 = vector.load %arg12[%c0_107, %c113_108] : memref<4x512xf32, #tpu.memory_space<vmem>>, vector<4x256xf32>
    %150 = vector.broadcast %30 : vector<1x256xf32> to vector<4x256xf32>
    %151 = arith.mulf %149, %150 : vector<4x256xf32>
    %c1_109 = arith.constant 1 : index
    %c2_110 = arith.constant 2 : index
    %c0_111 = arith.constant 0 : index
    %c0_112 = arith.constant 0 : index
    %152 = vector.load %arg5[%c1_109, %c2_110, %c0_111, %c0_112] : memref<2x9x4x4xf32, #tpu.memory_space<vmem>>, vector<1x1x4x4xf32>
    %153 = vector.shape_cast %152 : vector<1x1x4x4xf32> to vector<4x4xf32>
    %cst_113 = arith.constant dense<0.000000e+00> : vector<4x256xf32>
    %154 = tpu.matmul %153, %151, %cst_113 {dimension_numbers = #tpu.dot_dimension_numbers<[1], [0], [0], [1], [0, 0, 1, 1], [], []>} : vector<4x4xf32>, vector<4x256xf32>, vector<4x256xf32> -> vector<4x256xf32>
    %155 = arith.addf %148, %154 : vector<4x256xf32>
    %c0_114 = arith.constant 0 : index
    %c127_115 = arith.constant 127 : index
    %156 = vector.load %arg12[%c0_114, %c127_115] : memref<4x512xf32, #tpu.memory_space<vmem>>, vector<4x256xf32>
    %157 = vector.broadcast %26 : vector<1x256xf32> to vector<4x256xf32>
    %158 = arith.mulf %156, %157 : vector<4x256xf32>
    %c1_116 = arith.constant 1 : index
    %c3_117 = arith.constant 3 : index
    %c0_118 = arith.constant 0 : index
    %c0_119 = arith.constant 0 : index
    %159 = vector.load %arg5[%c1_116, %c3_117, %c0_118, %c0_119] : memref<2x9x4x4xf32, #tpu.memory_space<vmem>>, vector<1x1x4x4xf32>
    %160 = vector.shape_cast %159 : vector<1x1x4x4xf32> to vector<4x4xf32>
    %cst_120 = arith.constant dense<0.000000e+00> : vector<4x256xf32>
    %161 = tpu.matmul %160, %158, %cst_120 {dimension_numbers = #tpu.dot_dimension_numbers<[1], [0], [0], [1], [0, 0, 1, 1], [], []>} : vector<4x4xf32>, vector<4x256xf32>, vector<4x256xf32> -> vector<4x256xf32>
    %162 = arith.addf %155, %161 : vector<4x256xf32>
    %c0_121 = arith.constant 0 : index
    %c128_122 = arith.constant 128 : index
    %163 = vector.load %arg12[%c0_121, %c128_122] : memref<4x512xf32, #tpu.memory_space<vmem>>, vector<4x256xf32>
    %c1_123 = arith.constant 1 : index
    %c4_124 = arith.constant 4 : index
    %c0_125 = arith.constant 0 : index
    %c0_126 = arith.constant 0 : index
    %164 = vector.load %arg5[%c1_123, %c4_124, %c0_125, %c0_126] : memref<2x9x4x4xf32, #tpu.memory_space<vmem>>, vector<1x1x4x4xf32>
    %165 = vector.shape_cast %164 : vector<1x1x4x4xf32> to vector<4x4xf32>
    %cst_127 = arith.constant dense<0.000000e+00> : vector<4x256xf32>
    %166 = tpu.matmul %165, %163, %cst_127 {dimension_numbers = #tpu.dot_dimension_numbers<[1], [0], [0], [1], [0, 0, 1, 1], [], []>} : vector<4x4xf32>, vector<4x256xf32>, vector<4x256xf32> -> vector<4x256xf32>
    %167 = arith.addf %162, %166 : vector<4x256xf32>
    %c0_128 = arith.constant 0 : index
    %c129_129 = arith.constant 129 : index
    %168 = vector.load %arg12[%c0_128, %c129_129] : memref<4x512xf32, #tpu.memory_space<vmem>>, vector<4x256xf32>
    %169 = vector.broadcast %30 : vector<1x256xf32> to vector<4x256xf32>
    %170 = arith.mulf %168, %169 : vector<4x256xf32>
    %c1_130 = arith.constant 1 : index
    %c5_131 = arith.constant 5 : index
    %c0_132 = arith.constant 0 : index
    %c0_133 = arith.constant 0 : index
    %171 = vector.load %arg5[%c1_130, %c5_131, %c0_132, %c0_133] : memref<2x9x4x4xf32, #tpu.memory_space<vmem>>, vector<1x1x4x4xf32>
    %172 = vector.shape_cast %171 : vector<1x1x4x4xf32> to vector<4x4xf32>
    %cst_134 = arith.constant dense<0.000000e+00> : vector<4x256xf32>
    %173 = tpu.matmul %172, %170, %cst_134 {dimension_numbers = #tpu.dot_dimension_numbers<[1], [0], [0], [1], [0, 0, 1, 1], [], []>} : vector<4x4xf32>, vector<4x256xf32>, vector<4x256xf32> -> vector<4x256xf32>
    %174 = arith.addf %167, %173 : vector<4x256xf32>
    %c0_135 = arith.constant 0 : index
    %c143_136 = arith.constant 143 : index
    %175 = vector.load %arg12[%c0_135, %c143_136] : memref<4x512xf32, #tpu.memory_space<vmem>>, vector<4x256xf32>
    %176 = vector.broadcast %26 : vector<1x256xf32> to vector<4x256xf32>
    %177 = arith.mulf %175, %176 : vector<4x256xf32>
    %c1_137 = arith.constant 1 : index
    %c6_138 = arith.constant 6 : index
    %c0_139 = arith.constant 0 : index
    %c0_140 = arith.constant 0 : index
    %178 = vector.load %arg5[%c1_137, %c6_138, %c0_139, %c0_140] : memref<2x9x4x4xf32, #tpu.memory_space<vmem>>, vector<1x1x4x4xf32>
    %179 = vector.shape_cast %178 : vector<1x1x4x4xf32> to vector<4x4xf32>
    %cst_141 = arith.constant dense<0.000000e+00> : vector<4x256xf32>
    %180 = tpu.matmul %179, %177, %cst_141 {dimension_numbers = #tpu.dot_dimension_numbers<[1], [0], [0], [1], [0, 0, 1, 1], [], []>} : vector<4x4xf32>, vector<4x256xf32>, vector<4x256xf32> -> vector<4x256xf32>
    %181 = arith.addf %174, %180 : vector<4x256xf32>
    %c0_142 = arith.constant 0 : index
    %c144_143 = arith.constant 144 : index
    %182 = vector.load %arg12[%c0_142, %c144_143] : memref<4x512xf32, #tpu.memory_space<vmem>>, vector<4x256xf32>
    %c1_144 = arith.constant 1 : index
    %c7_145 = arith.constant 7 : index
    %c0_146 = arith.constant 0 : index
    %c0_147 = arith.constant 0 : index
    %183 = vector.load %arg5[%c1_144, %c7_145, %c0_146, %c0_147] : memref<2x9x4x4xf32, #tpu.memory_space<vmem>>, vector<1x1x4x4xf32>
    %184 = vector.shape_cast %183 : vector<1x1x4x4xf32> to vector<4x4xf32>
    %cst_148 = arith.constant dense<0.000000e+00> : vector<4x256xf32>
    %185 = tpu.matmul %184, %182, %cst_148 {dimension_numbers = #tpu.dot_dimension_numbers<[1], [0], [0], [1], [0, 0, 1, 1], [], []>} : vector<4x4xf32>, vector<4x256xf32>, vector<4x256xf32> -> vector<4x256xf32>
    %186 = arith.addf %181, %185 : vector<4x256xf32>
    %c0_149 = arith.constant 0 : index
    %c145_150 = arith.constant 145 : index
    %187 = vector.load %arg12[%c0_149, %c145_150] : memref<4x512xf32, #tpu.memory_space<vmem>>, vector<4x256xf32>
    %188 = vector.broadcast %30 : vector<1x256xf32> to vector<4x256xf32>
    %189 = arith.mulf %187, %188 : vector<4x256xf32>
    %c1_151 = arith.constant 1 : index
    %c8_152 = arith.constant 8 : index
    %c0_153 = arith.constant 0 : index
    %c0_154 = arith.constant 0 : index
    %190 = vector.load %arg5[%c1_151, %c8_152, %c0_153, %c0_154] : memref<2x9x4x4xf32, #tpu.memory_space<vmem>>, vector<1x1x4x4xf32>
    %191 = vector.shape_cast %190 : vector<1x1x4x4xf32> to vector<4x4xf32>
    %cst_155 = arith.constant dense<0.000000e+00> : vector<4x256xf32>
    %192 = tpu.matmul %191, %189, %cst_155 {dimension_numbers = #tpu.dot_dimension_numbers<[1], [0], [0], [1], [0, 0, 1, 1], [], []>} : vector<4x4xf32>, vector<4x256xf32>, vector<4x256xf32> -> vector<4x256xf32>
    %193 = arith.addf %186, %192 : vector<4x256xf32>
    %c1_156 = arith.constant 1 : index
    %c0_157 = arith.constant 0 : index
    %c0_158 = arith.constant 0 : index
    %194 = vector.load %arg6[%c1_156, %c0_157, %c0_158] : memref<2x4x1xf32, #tpu.memory_space<vmem>>, vector<1x4x1xf32>
    %195 = vector.shape_cast %194 : vector<1x4x1xf32> to vector<4x1xf32>
    %196 = vector.broadcast %195 : vector<4x1xf32> to vector<4x256xf32>
    %197 = arith.addf %193, %196 : vector<4x256xf32>
    %cst_159 = arith.constant 0.000000e+00 : f32
    %198 = vector.broadcast %cst_159 : f32 to vector<4x256xf32>
    %199 = arith.cmpf ogt, %197, %198 : vector<4x256xf32>
    %200 = vector.broadcast %122 : f32 to vector<4x256xf32>
    %201 = arith.mulf %200, %197 : vector<4x256xf32>
    %202 = arith.select %199, %197, %201 : vector<4x256xi1>, vector<4x256xf32>
    %c1_160 = arith.constant 1 : index
    %c0_161 = arith.constant 0 : index
    %c0_162 = arith.constant 0 : index
    %203 = vector.load %arg7[%c1_160, %c0_161, %c0_162] : memref<2x16x4xf32, #tpu.memory_space<vmem>>, vector<1x16x4xf32>
    %204 = vector.shape_cast %203 : vector<1x16x4xf32> to vector<16x4xf32>
    %cst_163 = arith.constant dense<0.000000e+00> : vector<16x256xf32>
    %205 = tpu.matmul %204, %202, %cst_163 {dimension_numbers = #tpu.dot_dimension_numbers<[1], [0], [0], [1], [0, 0, 1, 1], [], []>} : vector<16x4xf32>, vector<4x256xf32>, vector<16x256xf32> -> vector<16x256xf32>
    %206 = arith.addf %120, %205 : vector<16x256xf32>
    %c1_164 = arith.constant 1 : index
    %c0_165 = arith.constant 0 : index
    %c0_166 = arith.constant 0 : index
    %207 = vector.load %arg8[%c1_164, %c0_165, %c0_166] : memref<2x16x1xf32, #tpu.memory_space<vmem>>, vector<1x16x1xf32>
    %208 = vector.shape_cast %207 : vector<1x16x1xf32> to vector<16x1xf32>
    %209 = vector.broadcast %208 : vector<16x1xf32> to vector<16x256xf32>
    %210 = arith.addf %206, %209 : vector<16x256xf32>
    %c0_167 = arith.constant 0 : index
    %c0_168 = arith.constant 0 : index
    %211 = vector.load %arg9[%c0_167, %c0_168] : memref<16x16xf32, #tpu.memory_space<vmem>>, vector<16x16xf32>
    %cst_169 = arith.constant dense<0.000000e+00> : vector<16x256xf32>
    %212 = tpu.matmul %211, %210, %cst_169 {dimension_numbers = #tpu.dot_dimension_numbers<[1], [0], [0], [1], [0, 0, 1, 1], [], []>} : vector<16x16xf32>, vector<16x256xf32>, vector<16x256xf32> -> vector<16x256xf32>
    %c0_170 = arith.constant 0 : index
    %c0_171 = arith.constant 0 : index
    %213 = vector.load %arg10[%c0_170, %c0_171] : memref<16x1xf32, #tpu.memory_space<vmem>>, vector<16x1xf32>
    %214 = vector.broadcast %213 : vector<16x1xf32> to vector<16x256xf32>
    %215 = arith.addf %212, %214 : vector<16x256xf32>
    %216 = arith.addf %1, %215 : vector<16x256xf32>
    %c0_172 = arith.constant 0 : index
    %c0_173 = arith.constant 0 : index
    %c0_174 = arith.constant 0 : index
    %217 = vector.load %arg11[%c0_172, %c0_173, %c0_174] : memref<1x16x256xf32, #tpu.memory_space<vmem>>, vector<1x16x256xf32>
    %218 = vector.shape_cast %217 : vector<1x16x256xf32> to vector<16x256xf32>
    %219 = vector.shape_cast %216 : vector<16x256xf32> to vector<1x16x256xf32>
    tpu.vector_store %arg11[%c0_172, %c0_173, %c0_174], %219 {strides = array<i32>} : memref<1x16x256xf32, #tpu.memory_space<vmem>>, vector<1x16x256xf32>,
    return
  }
  func.func @transform_0(%arg0: i32) -> (i32, i32, i32) {
    %c0_i32 = arith.constant 0 : i32
    %c0_i32_0 = arith.constant 0 : i32
    %c0_i32_1 = arith.constant 0 : i32
    return %arg0, %c0_i32, %c0_i32_0 : i32, i32, i32
  }
  func.func @transform_1(%arg0: i32) -> i32 {
    %c0_i32 = arith.constant 0 : i32
    %c0_i32_0 = arith.constant 0 : i32
    return %c0_i32 : i32
  }
  func.func @transform_2(%arg0: i32) -> (i32, i32, i32) {
    %c0_i32 = arith.constant 0 : i32
    %c0_i32_0 = arith.constant 0 : i32
    %c0_i32_1 = arith.constant 0 : i32
    %c0_i32_2 = arith.constant 0 : i32
    return %c0_i32, %c0_i32_0, %c0_i32_1 : i32, i32, i32
  }
  func.func @transform_3(%arg0: i32) -> (i32, i32, i32) {
    %c0_i32 = arith.constant 0 : i32
    %c0_i32_0 = arith.constant 0 : i32
    %c0_i32_1 = arith.constant 0 : i32
    %c0_i32_2 = arith.constant 0 : i32
    return %c0_i32, %c0_i32_0, %c0_i32_1 : i32, i32, i32
  }
  func.func @transform_4(%arg0: i32) -> (i32, i32, i32, i32) {
    %c0_i32 = arith.constant 0 : i32
    %c0_i32_0 = arith.constant 0 : i32
    %c0_i32_1 = arith.constant 0 : i32
    %c0_i32_2 = arith.constant 0 : i32
    %c0_i32_3 = arith.constant 0 : i32
    return %c0_i32, %c0_i32_0, %c0_i32_1, %c0_i32_2 : i32, i32, i32, i32
  }
  func.func @transform_5(%arg0: i32) -> (i32, i32, i32) {
    %c0_i32 = arith.constant 0 : i32
    %c0_i32_0 = arith.constant 0 : i32
    %c0_i32_1 = arith.constant 0 : i32
    %c0_i32_2 = arith.constant 0 : i32
    return %c0_i32, %c0_i32_0, %c0_i32_1 : i32, i32, i32
  }
  func.func @transform_6(%arg0: i32) -> (i32, i32, i32) {
    %c0_i32 = arith.constant 0 : i32
    %c0_i32_0 = arith.constant 0 : i32
    %c0_i32_1 = arith.constant 0 : i32
    %c0_i32_2 = arith.constant 0 : i32
    return %c0_i32, %c0_i32_0, %c0_i32_1 : i32, i32, i32
  }
  func.func @transform_7(%arg0: i32) -> (i32, i32, i32) {
    %c0_i32 = arith.constant 0 : i32
    %c0_i32_0 = arith.constant 0 : i32
    %c0_i32_1 = arith.constant 0 : i32
    %c0_i32_2 = arith.constant 0 : i32
    return %c0_i32, %c0_i32_0, %c0_i32_1 : i32, i32, i32
  }
  func.func @transform_8(%arg0: i32) -> (i32, i32) {
    %c0_i32 = arith.constant 0 : i32
    %c0_i32_0 = arith.constant 0 : i32
    %c0_i32_1 = arith.constant 0 : i32
    return %c0_i32, %c0_i32_0 : i32, i32
  }
  func.func @transform_9(%arg0: i32) -> (i32, i32) {
    %c0_i32 = arith.constant 0 : i32
    %c0_i32_0 = arith.constant 0 : i32
    %c0_i32_1 = arith.constant 0 : i32
    return %c0_i32, %c0_i32_0 : i32, i32
  }
  func.func @transform_10(%arg0: i32) -> (i32, i32, i32) {
    %c0_i32 = arith.constant 0 : i32
    %c0_i32_0 = arith.constant 0 : i32
    %c0_i32_1 = arith.constant 0 : i32
    return %arg0, %c0_i32, %c0_i32_0 : i32, i32, i32
  }
}

</mosaic_0001>

<bundles_post_ra>
// kernel: tpu_custom_call.1
= control target key start
LH: loop header
LB: loop body
LE: loop exit
PB: predicated region body
PF: predicated region fallthrough
CT: control target
= control target key end

     0   :  { %15 = vsyncpa [#allocation5], 0  ;;  %s3716_s0 = inlined_call_operand.vmem [shape: f32[2,16,256], index: 0, kind: input, shape index: {}]   ;;  %s3717_s1 = inlined_call_operand.vmem [shape: f32[4], index: 1, kind: input, shape index: {}]   ;;  %s3718_s2 = inlined_call_operand.vmem [shape: f32[2,4,16], index: 2, kind: input, shape index: {}]   ;;  %s3719_s3 = inlined_call_operand.vmem [shape: f32[2,4,1], index: 3, kind: input, shape index: {}]   ;;  %s3720_s4 = inlined_call_operand.vmem [shape: f32[2,9,4,4], index: 4, kind: input, shape index: {}]   ;;  %s3721_s5 = inlined_call_operand.vmem [shape: f32[2,4,1], index: 5, kind: input, shape index: {}]   ;;  %s3722_s6 = inlined_call_operand.vmem [shape: f32[2,16,4], index: 6, kind: input, shape index: {}]   ;;  %s3723_s7 = inlined_call_operand.vmem [shape: f32[2,16,1], index: 7, kind: input, shape index: {}]   ;;  %s3724_s8 = inlined_call_operand.vmem [shape: f32[16,16], index: 8, kind: input, shape index: {}]   ;;  %s3725_s9 = inlined_call_operand.vmem [shape: f32[16,1], index: 9, kind: input, shape index: {}]   ;;  %s3726_s10 = inlined_call_operand.hbm [shape: f32[2,16,256], index: 10, kind: output, shape index: {}]  }
   0x1   :  { %16 = vsyncpa [#allocation4], 0 }
   0x2   :  { %18 = vsyncpa [#allocation4 + $0x1], 0  ;;  %s3185_s13 = smov 0   ;;  %s3187_s14 = smov 0  }
   0x3   :  { %s3189_s15 = smov 0   ;;  %s3191_s16 = smov 0  }
   0x4 LB: > { %s3206_s17 = sadd.s32 4294967295, %s3115_s16   ;;  %s2810_s18 = sadd.s32 4294967294, %s3115_s16   ;;  %s3115_s16 = sphi %s3191_s16, %s3750_s16   ;;  %s3111_s15 = sphi %s3189_s15, %s3749_s15   ;;  %s3107_s14 = sphi %s3187_s14, %s3748_s14   ;;  %s3103_s13 = sphi %s3185_s13, %s3747_s13  }
   0x5   : > { %s3210_s19 = sadd.s32 1, %s3115_s16   ;;  %s246_s20 = sadd.s32 1, %s3111_s15 }
   0x6   : > { %s243_s21 = ssub.s32 %s3115_s16, %s3210_s19  ;;  %p256_p0 = scmp.ne.s32.totalorder %s3111_s15, %s3107_s14 }
   0x7   : > { %p244_p1 = scmp.eq.s32.totalorder %s243_s21, 0  ;;  %p257_p2 = scmp.eq.s32.totalorder %s3206_s17, 1 }
   0x8   : > { %p262_p3 = scmp.ne.s32.totalorder %s3107_s14, %s3103_s13  ;;  %p263_p4 = scmp.eq.s32.totalorder %s2810_s18, 1 }
   0x9   : > { %s3221_s22 = scalar_select %p244_p1, %s3111_s15, %s246_s20  }
   0xa   : > { %p3223_p5 = por %p257_p2, %p256_p0  ;;  %p3227_p6 = por %p263_p4, %p262_p3 }
   0xb   : > { %p2811_p7 = scmp.ge.s32.totalorder %s3115_s16, 1  ;;  %p270_p8 = scmp.lt.s32.totalorder %s3115_s16, 3 }
   0xc   : > { %p2981_p9 = scmp.eq.s32.totalorder %s3206_s17, 0  ;;  %s283_s28 = sshll.u32 %s3717_s1, 4  ;;  %s284_s28 = int_to_ptr.vmem [resolvable:$true] %s283_s28 }
   0xd   : > { %p3234_p10 = pnand %p2811_p7, %p270_p8  ;;  %s3034_s29 = scalar_lea.vmem %s284_s28, 16 }
   0xe   : > { %p3035_p13 = scmp.ne.s32.totalorder %s284_s28, %s3034_s29  ;;  %p3042_p3 = scmp.lt.s32.totalorder %s284_s28, %s284_s28 }
   0xf   : > { %p2973_p11 = pneg %p3234_p10  ;;  %p3043_p4 = scmp.lt.s32.totalorder %s3034_s29, %s3034_s29 }
  0x11   : > { %p2974_p12 = pnand %p2981_p9, %p2973_p11  ;;  %p3044_p7 = por %p3043_p4, %p3042_p3 }
  0x13   : > { %p3036_p0 = pneg %p2974_p12 }
  0x15   : > { %p3037_p1 = pnand %p3036_p0, %p3035_p13 }
  0x17   : > { %p3038_p2 = pneg %p3037_p1 }
  0x19   : > { %p3045_p8 = pnand %p3044_p7, %p3038_p2 }
  0x1b   : > { %3048 = shalt.err (!%p3045_p8)
}
  0x1c   : > { %s3117_s30 = smov [#allocation3]   ;;  %328 = sbr.rel (%p3234_p10) target bundleno = 2011 (0x7db), region = 60 }
  0x1d   : > { %2976 = dma.vmem_to_smem (!%p2974_p12), %s284_s28, 16, %s3117_s30, [#allocation5]  }
  0x23   : > { %3094 = dma.done.wait (%p2981_p9), [#allocation5], 16  }
  0x24   : > { %3096 = vsyncadd (%p2981_p9), [#allocation5], 4294967280 }
  0x25   : > { %334 = sfence }
  0x26   : > { %p367_p11 = scmp.lt.s32.totalorder %s3206_s17, 1  ;;  %v378_v0 = vlaneseq  ;;  %v3118_v1 = vmov 0.0   ;;  %v3119_v2 = vmov 0   ;;  %v420_v3 = vld [vmem:[%s3719_s3] sm:$0xf]  ;;  %vm426_vm4 = vcmask 130048  }
  0x27   : > { %494 = vmatprep.mubr.f32.mxu0 %v3118_v1  ;;  %376 = vst [vmem:[#allocation2] sm:$0xf] %v3118_v1  ;;  %377 = vst [vmem:[#allocation2 + $0xc] sm:$0xf] %v3118_v1  ;;  %3028 = vset.pattern.permute.xlu0 %v3119_v2  ;;  %v419_v18 = vld [vmem:[%s3718_s2] sm:$0xf] }
  0x28   : > { %s368_s18 = scalar_select %p367_p11, %s3206_s17, 1  ;;  %423 = vperm.xlu0 %3028, %v420_v3   ;;  %v379_v4 = vand.u32 127, %v378_v0  ;;  %614 = vmatprep.mubr.f32.mxu1 %v3118_v1  ;;  %vm521_vm7 = vcmask 908288   ;;  %vm719_vm8 = vcmask 924672   ;;  %vm824_vm9 = vcmask 1039360  }
  0x29   : > { %3029 = vset.pattern.permute.xlu1 %v3119_v2  ;;  %s3727_s29 = smov 113   ;;  %s3121_s30 = smov 111   ;;  %vm841_vm10 = vcmask 7168   ;;  %vm736_vm11 = vcmask 121856   ;;  %vm630_vm12 = vcmask 138240   ;;  %vm545_vm13 = vcmask 1043456  }
  0x2a   : > { %s2921_s20 = sshll.u32 %s368_s18, 5  ;;  %v380_v5 = vadd.s32 128, %v379_v4  ;;  %v385_v6 = vand.u32 15, %v379_v4  ;;  %s3729_s11 = smov 127   ;;  %vm541_vm14 = vcmask 31744   ;;  %vm1228_vm15 = vcmask 916480  }
  0x2b   : > { %s371_s26 = scalar_lea.vmem %s3716_s0, %s2921_s20  ;;  %s3731_s12 = smov 1  }
  0x2c   : > { %v3263_v7 = vld [vmem:[%s371_s26 + $0x8] sm:$0xff]  ;;  %v3265_v8 = vld [vmem:[%s371_s26 + $0x18] sm:$0xff]  ;;  %v3267_v9 = vld [vmem:[%s371_s26] sm:$0xff]  ;;  %v392_v10 = vand.u32 15, %v380_v5  ;;  %vm411_vm0 = vcmp.ne.s32.totalorder %v385_v6, 15  ;;  %vm405_vm1 = vcmp.ne.s32.totalorder %v385_v6, 0 }
  0x2d   : > { %v2923_v11 = vpack.c.bf16 %v3265_v8, %v3263_v7  ;;  %v3271_v12 = vld [vmem:[%s371_s26 + $0x10] sm:$0xff]  ;;  %v2821_v13 = vsel %vm411_vm0, 1.0, %v3118_v1  ;;  %v2819_v14 = vsel %vm405_vm1, 1.0, %v3118_v1  ;;  %s3735_s18 = smov 15   ;;  %s3125_s20 = smov 17  }
  0x2e   : > { %v2925_v15 = vpack.c.bf16 %v3271_v12, %v3267_v9  ;;  %vm412_vm2 = vcmp.ne.s32.totalorder %v392_v10, 15  ;;  %vm406_vm3 = vcmp.ne.s32.totalorder %v392_v10, 0  ;;  %s417_s21 = sld [smem:[#allocation3]]  ;;  %s3737_s25 = smov 16   ;;  %v1010_v59 = vld [vmem:[#allocation2 + $0xc] sm:$0xf] }
  0x2f   : > { %2924 = vmatprep.subr.bf16.mxu0 %v2923_v11  ;;  %v2822_v16 = vsel %vm412_vm2, 1.0, %v3118_v1  ;;  %v2820_v17 = vsel %vm406_vm3, 1.0, %v3118_v1  ;;  %v1113_v6 = vld [vmem:[#allocation2 + $0xc] sm:$0xf]  ;;  %s3733_s26 = smov 112   ;;  %s2864_s27 = sld [smem:[#allocation3 + $0x2]] }
  0x30   : > { %2926 = vmatpush1.bf16.msra.mxu0 %v2925_v15  ;;  %v715_v19 = vcombine.low %v2821_v13, %v2822_v16  ;;  %v517_v20 = vcombine.low %v2819_v14, %v2820_v17  ;;  %v1216_v13 = vld [vmem:[#allocation2 + $0xc] sm:$0xf] }
  0x31   : > { %v1312_v17 = vld [vmem:[#allocation2 + $0xc] sm:$0xf] }
  0x32   : > { %716 = vrot.lane.b32.xlu1 %v715_v19, %s3727_s29  ;;  %518 = vrot.lane.b32.xlu0 %v517_v20, %s3121_s30 }
  0x33   : > { %2824 = vmatmul.mubr.msk.f32.vlgmr.msra.gmra.mrb[0].mxu0 %vm426_vm4, %v419_v18 }
  0x34   : > { %1507 = vmatprep.mubr.f32.mxu0 %v3118_v1  ;;  %v503_v23 = vstv %s417_s21  ;;  %s2922_s21 = sshll.u32 %s3206_s17, 9 }
  0x36   : > { %821 = vrot.lane.b32.xlu1 %v517_v20, %s3729_s11  ;;  %1011 = vrot.lane.b32.xlu0 %v715_v19, %s3731_s12 }
  0x3a   : > { %1114 = vrot.lane.b32.xlu1 %v517_v20, %s3735_s18  ;;  %1313 = vrot.lane.b32.xlu0 %v715_v19, %s3125_s20  ;;  %v1524_v19 = vld [vmem:[%s3723_s7] sm:$0xff] }
  0x3b   : > { %v2867_v20 = vld [vmem:[%s3719_s3 + $0x4] sm:$0xf] }
  0xa4   : > { %v717_v34 = vpop.permute.xlu1 %716 }
  0xa5   : > { %v3304_v40 = vrot.slane %v717_v34, 4 }
  0xa7   : > { %v424_v21 = vpop.permute.xlu0 %423  ;;  %v3312_v44 = vsel %vm719_vm8, %v3304_v40, %v717_v34 }
  0xa8   : > { %v822_v41 = vpop.permute.xlu1 %821 }
  0xa9   : > { %v3307_v43 = vrot.slane %v822_v41, 4 }
  0xab   : > { %v519_v32 = vpop.permute.xlu0 %518  ;;  %v3317_v45 = vsel %vm824_vm9, %v3307_v43, %v822_v41 }
  0xac   : > { %v3296_v33 = vrot.slane %v519_v32, 4  ;;  %v1115_v52 = vpop.permute.xlu1 %1114 }
  0xad   : > { %v3329_v56 = vrot.slane %v1115_v52, 4 }
  0xae   : > { %v3300_v35 = vsel %vm521_vm7, %v3296_v33, %v519_v32 }
  0xaf   : > { %v1012_v51 = vpop.permute.xlu0 %1011  ;;  %v3339_v60 = vsel %vm736_vm11, %v3329_v56, %v1115_v52  ;;  %v1121_v10 = vmul.f32 %v3329_v56, %v1113_v6  ;;  %v2844_v6 = vld [vmem:[%s3720_s4 + $0x14] sm:$0xf] }
  0xb0   : > { %v3326_v54 = vrot.slane %v1012_v51, 4 }
  0xb2   : > { %v3334_v57 = vsel %vm841_vm10, %v3326_v54, %v1012_v51  ;;  %v1018_v63 = vmul.f32 %v3326_v54, %v1010_v59 }
  0xb3   : > { %v1314_v2 = vpop.permute.xlu0 %1313 }
  0xb4   : > { %v3351_v5 = vrot.slane %v1314_v2, 4 }
  0xb6   : > { %v3358_v11 = vsel %vm630_vm12, %v3351_v5, %v1314_v2  ;;  %v1320_v18 = vmul.f32 %v3351_v5, %v1312_v17 }
 0x106   : > { %v496_v22 = vpop.f32.mrb[0].mxu0 }
 0x107   : > { %v497_v24 = vadd.f32 %v496_v22, %v424_v21  ;;  %v498_v25 = vpop.f32.mrb[1].mxu0  ;;  %v1525_v22 = vld [vmem:[%s3723_s7 + $0x8] sm:$0xff] }
 0x108   : > { %v499_v26 = vadd.f32 %v498_v25, %v424_v21  ;;  %v1414_v21 = vld [vmem:[%s3721_s5] sm:$0xf] }
 0x109   : > { %vm501_vm5 = vcmp.gt.f32.partialorder %v497_v24, 0.0  ;;  %v504_v27 = vmul.f32 %v503_v23, %v497_v24 }
 0x10a   : > { %vm502_vm6 = vcmp.gt.f32.partialorder %v499_v26, 0.0  ;;  %v505_v28 = vmul.f32 %v503_v23, %v499_v26 }
 0x10b   : > { %v506_v29 = vsel %vm501_vm5, %v497_v24, %v504_v27 }
 0x10c   : > { %v3290_v30 = vsel %vm502_vm6, %v499_v26, %v505_v28  ;;  %v2825_v28 = vld [vmem:[%s3720_s4 + $0x4] sm:$0xf] }
 0x10d   : > { %v3293_v31 = vcombine.low %v506_v29, %v3290_v30  ;;  %v3032_v15 = vcombine.low %v3290_v30, %v3290_v30 }
 0x10f   : > { %512 = vst [vmem:[#allocation2 + $0x4] sm:$0xff] %v3293_v31  ;;  %v1017_v61 = vmul.f32 %v3334_v57, %v3293_v31  ;;  %v1120_v0 = vmul.f32 %v3339_v60, %v3293_v31  ;;  %v1319_v14 = vmul.f32 %v3358_v11, %v3293_v31 }
 0x111   : > { %v1023_v3 = vcombine.high %v1017_v61, %v1017_v61  ;;  %v1126_v4 = vcombine.high %v1120_v0, %v1120_v0  ;;  %v1325_v16 = vcombine.high %v1319_v14, %v1319_v14 }
 0x116   : > { %v711_v36 = vld [vmem:[#allocation2] sm:$0xff]  ;;  %v514_v37 = vld [vmem:[#allocation2 + $0x8] sm:$0xf] }
 0x117   : > { %v525_v38 = vmul.f32 %v711_v36, %v3300_v35  ;;  %537 = vrot.lane.b32.xlu0 %v514_v37, %s3737_s25  ;;  %v532_v39 = vcombine.high %v711_v36, %v711_v36  ;;  %v712_v46 = vld [vmem:[#allocation2 + $0x8] sm:$0xf]  ;;  %v723_v47 = vmul.f32 %v3312_v44, %v711_v36  ;;  %v526_v48 = vmul.f32 %v3296_v33, %v514_v37 }
 0x118   : > { %v828_v49 = vmul.f32 %v3317_v45, %v711_v36  ;;  %v724_v50 = vmul.f32 %v3304_v40, %v712_v46  ;;  %v820_v58 = vld [vmem:[#allocation2 + $0x8] sm:$0xf] }
 0x119   : > { %535 = vrot.lane.b32.xlu1 %v532_v39, %s3737_s25  ;;  %v623_v42 = vcombine.high %v525_v38, %v525_v38  ;;  %v729_v53 = vcombine.high %v723_v47, %v723_v47  ;;  %v829_v62 = vmul.f32 %v3307_v43, %v820_v58  ;;  %v527_v39 = vld [vmem:[%s3720_s4] sm:$0xf] }
 0x11a   : > { %v834_v55 = vcombine.high %v828_v49, %v828_v49 }
 0x11b   : > { %626 = vrot.lane.b32.xlu0 %v623_v42, %s3125_s20 }
 0x11d   : > { %533 = vrot.lane.b32.xlu1 %v711_v36, %s3737_s25 }
 0x11f   : > { %624 = vrot.lane.b32.xlu0 %v525_v38, %s3125_s20 }
 0x121   : > { %628 = vrot.lane.b32.xlu1 %v526_v48, %s3125_s20 }
 0x123   : > { %734 = vrot.lane.b32.xlu0 %v724_v50, %s3735_s18  ;;  %v2832_v50 = vld [vmem:[%s3720_s4 + $0x8] sm:$0xf] }
 0x125   : > { %732 = vrot.lane.b32.xlu1 %v729_v53, %s3735_s18 }
 0x127   : > { %837 = vrot.lane.b32.xlu0 %v834_v55, %s3731_s12  ;;  %v2836_v55 = vld [vmem:[%s3720_s4 + $0xc] sm:$0xf] }
 0x129   : > { %730 = vrot.lane.b32.xlu1 %v723_v47, %s3735_s18  ;;  %s3744_s18 = smov 113  }
 0x12b   : > { %835 = vrot.lane.b32.xlu0 %v828_v49, %s3731_s12 }
 0x12d   : > { %839 = vrot.lane.b32.xlu1 %v829_v62, %s3731_s12  ;;  %s3742_s12 = smov 1  }
 0x12f   : > { %1028 = vrot.lane.b32.xlu0 %v1018_v63, %s3729_s11 }
 0x131   : > { %1026 = vrot.lane.b32.xlu1 %v1023_v3, %s3729_s11 }
 0x133   : > { %1129 = vrot.lane.b32.xlu0 %v1126_v4, %s3727_s29 }
 0x135   : > { %1024 = vrot.lane.b32.xlu1 %v1017_v61, %s3729_s11  ;;  %s2823_s11 = sld [smem:[#allocation3 + $0x1]] }
 0x137   : > { %1127 = vrot.lane.b32.xlu0 %v1120_v0, %s3727_s29  ;;  %v2840_v0 = vld [vmem:[%s3720_s4 + $0x10] sm:$0xf] }
 0x139   : > { %1131 = vrot.lane.b32.xlu1 %v1121_v10, %s3727_s29 }
 0x13b   : > { %1226 = vrot.lane.b32.xlu0 %v1216_v13, %s3733_s26 }
 0x13d   : > { %1224 = vrot.lane.b32.xlu1 %v3032_v15, %s3733_s26 }
 0x13f   : > { %1328 = vrot.lane.b32.xlu0 %v1325_v16, %s3121_s30  ;;  %v2848_v16 = vld [vmem:[%s3720_s4 + $0x18] sm:$0xf] }
 0x141   : > { %1222 = vrot.lane.b32.xlu1 %v3293_v31, %s3733_s26  ;;  %s3745_s26 = smov 112  }
 0x143   : > { %1326 = vrot.lane.b32.xlu0 %v1319_v14, %s3121_s30 }
 0x145   : > { %1330 = vrot.lane.b32.xlu1 %v1320_v18, %s3121_s30 }
 0x147   : > { %1528 = vperm.xlu0 %3028, %v1524_v19  }
 0x149   : > { %1417 = vperm.xlu1 %3029, %v1414_v21  }
 0x14b   : > { %1548 = vperm.xlu0 %3028, %v2867_v20  }
 0x14d   : > { %1533 = vperm.xlu1 %3029, %v1525_v22   ;;  %v2852_v22 = vld [vmem:[%s3720_s4 + $0x1c] sm:$0xf] }
 0x189   : > { %v538_v23 = vpop.permute.xlu0 %537 }
 0x18b   : > { %v536_v24 = vpop.permute.xlu1 %535 }
 0x18c   : > { %v540_v25 = vsel %vm426_vm4, %v536_v24, %v538_v23 }
 0x18d   : > { %2826 = vmatprep.subr.msk.mxu1 %vm545_vm13, %v540_v25  ;;  %v627_v26 = vpop.permute.xlu0 %626 }
 0x18f   : > { %v534_v27 = vpop.permute.xlu1 %533 }
 0x190   : > { %v539_v29 = vsel %vm426_vm4, %v534_v27, %v536_v24  ;;  %v2856_v24 = vld [vmem:[%s3720_s4 + $0x20] sm:$0xf]  ;;  %v1424_v27 = vstv %s2823_s11  ;;  %s3741_s11 = smov 15  }
 0x191   : > { %2827 = vmatpush1.msk.msra.mxu1 %vm545_vm13, %v539_v29  ;;  %v625_v30 = vpop.permute.xlu0 %624 }
 0x192   : > { %2828 = vmatmul.mubr.msk.f32.vlgmr.msra.gmra.mrb[0].mxu1 %vm541_vm14, %v2825_v28  ;;  %v631_v36 = vsel %vm630_vm12, %v625_v30, %v627_v26 }
 0x193   : > { %v629_v32 = vpop.permute.xlu1 %628  ;;  %704 = vmatprep.mubr.f32.mxu1 %v3118_v1 }
 0x194   : > { %v632_v34 = vsel %vm630_vm12, %v627_v26, %v629_v32 }
 0x195   : > { %2829 = vmatprep.subr.msk.mxu1 %vm545_vm13, %v632_v34  ;;  %v735_v37 = vpop.permute.xlu0 %734 }
 0x196   : > { %2830 = vmatpush1.msk.msra.mxu1 %vm545_vm13, %v631_v36 }
 0x197   : > { %v733_v38 = vpop.permute.xlu1 %732 }
 0x198   : > { %v738_v41 = vsel %vm736_vm11, %v733_v38, %v735_v37  ;;  %v1429_v37 = vld [vmem:[%s3722_s6] sm:$0xff] }
 0x199   : > { %2833 = vmatprep.subr.msk.mxu1 %vm545_vm13, %v738_v41  ;;  %v838_v42 = vpop.permute.xlu0 %837 }
 0x19a   : > { %2831 = vmatmul.mubr.msk.f32.vlgmr.msra.gmra.mrb[0].mxu1 %vm541_vm14, %v527_v39  ;;  %v1430_v39 = vld [vmem:[%s3722_s6 + $0x8] sm:$0xff] }
 0x19b   : > { %v731_v46 = vpop.permute.xlu1 %730  ;;  %810 = vmatprep.mubr.f32.mxu1 %v3118_v1 }
 0x19c   : > { %v737_v47 = vsel %vm736_vm11, %v731_v46, %v733_v38 }
 0x19d   : > { %2834 = vmatpush1.msk.msra.mxu1 %vm545_vm13, %v737_v47  ;;  %v836_v48 = vpop.permute.xlu0 %835 }
 0x19e   : > { %v842_v52 = vsel %vm841_vm10, %v836_v48, %v838_v42 }
 0x19f   : > { %v840_v49 = vpop.permute.xlu1 %839 }
 0x1a0   : > { %v843_v51 = vsel %vm841_vm10, %v838_v42, %v840_v49 }
 0x1a1   : > { %2837 = vmatprep.subr.msk.mxu1 %vm545_vm13, %v843_v51  ;;  %v1029_v58 = vpop.permute.xlu0 %1028 }
 0x1a2   : > { %2835 = vmatmul.mubr.msk.f32.vlgmr.msra.gmra.mrb[0].mxu1 %vm541_vm14, %v2832_v50 }
 0x1a3   : > { %2838 = vmatpush1.msk.msra.mxu1 %vm545_vm13, %v842_v52  ;;  %v1027_v53 = vpop.permute.xlu1 %1026  ;;  %915 = vmatprep.mubr.f32.mxu1 %v3118_v1 }
 0x1a4   : > { %2841 = vmatprep.subr.msk.mxu1 %vm545_vm13, %v3032_v15  ;;  %v1031_v61 = vsel %vm824_vm9, %v1027_v53, %v1029_v58 }
 0x1a5   : > { %v1130_v62 = vpop.permute.xlu0 %1129 }
 0x1a7   : > { %v1025_v59 = vpop.permute.xlu1 %1024 }
 0x1a8   : > { %v1030_v2 = vsel %vm824_vm9, %v1025_v59, %v1027_v53 }
 0x1aa   : > { %2839 = vmatmul.mubr.msk.f32.vlgmr.msra.gmra.mrb[0].mxu1 %vm541_vm14, %v2836_v55 }
 0x1ab   : > { %2842 = vmatpush1.msk.msra.mxu1 %vm545_vm13, %v3293_v31  ;;  %1000 = vmatprep.mubr.f32.mxu1 %v3118_v1  ;;  %v1132_v63 = vpop.permute.xlu1 %1131  ;;  %v1128_v31 = vpop.permute.xlu0 %1127 }
 0x1ac   : > { %2845 = vmatprep.subr.msk.mxu1 %vm545_vm13, %v1031_v61  ;;  %v1134_v3 = vsel %vm719_vm8, %v1130_v62, %v1132_v63  ;;  %v1133_v10 = vsel %vm719_vm8, %v1128_v31, %v1130_v62  ;;  %v1627_v31 = vstv %s2864_s27 }
 0x1af   : > { %v1225_v4 = vpop.permute.xlu1 %1224  ;;  %v1227_v13 = vpop.permute.xlu0 %1226 }
 0x1b0   : > { %v1230_v15 = vsel %vm1228_vm15, %v1225_v4, %v1227_v13 }
 0x1b2   : > { %2843 = vmatmul.mubr.msk.f32.vlgmr.msra.gmra.mrb[0].mxu1 %vm541_vm14, %v2840_v0  ;;  %v2866_v0 = vld [vmem:[%s3718_s2 + $0x4] sm:$0xf] }
 0x1b3   : > { %2846 = vmatpush1.msk.msra.mxu1 %vm545_vm13, %v1030_v2  ;;  %1103 = vmatprep.mubr.f32.mxu1 %v3118_v1  ;;  %v1223_v14 = vpop.permute.xlu1 %1222  ;;  %v1329_v18 = vpop.permute.xlu0 %1328 }
 0x1b4   : > { %2849 = vmatprep.subr.msk.mxu1 %vm545_vm13, %v1134_v3  ;;  %v1229_v19 = vsel %vm1228_vm15, %v1223_v14, %v1225_v4 }
 0x1b7   : > { %v1331_v17 = vpop.permute.xlu1 %1330  ;;  %v1327_v21 = vpop.permute.xlu0 %1326 }
 0x1b8   : > { %v1333_v20 = vsel %vm521_vm7, %v1329_v18, %v1331_v17  ;;  %v1332_v23 = vsel %vm521_vm7, %v1327_v21, %v1329_v18 }
 0x1ba   : > { %2847 = vmatmul.mubr.msk.f32.vlgmr.msra.gmra.mrb[0].mxu1 %vm541_vm14, %v2844_v6 }
 0x1bb   : > { %2850 = vmatpush1.msk.msra.mxu1 %vm545_vm13, %v1133_v10  ;;  %1206 = vmatprep.mubr.f32.mxu1 %v3118_v1 }
 0x1bc   : > { %2853 = vmatprep.subr.msk.mxu1 %vm545_vm13, %v1230_v15 }
 0x1c2   : > { %2851 = vmatmul.mubr.msk.f32.vlgmr.msra.gmra.mrb[0].mxu1 %vm541_vm14, %v2848_v16 }
 0x1c3   : > { %2854 = vmatpush1.msk.msra.mxu1 %vm545_vm13, %v1229_v19  ;;  %1302 = vmatprep.mubr.f32.mxu1 %v3118_v1 }
 0x1c4   : > { %2857 = vmatprep.subr.msk.mxu1 %vm545_vm13, %v1333_v20 }
 0x1c6   : > { %v1529_v53 = vpop.permute.xlu0 %1528 }
 0x1c8   : > { %v1418_v25 = vpop.permute.xlu1 %1417 }
 0x1ca   : > { %2855 = vmatmul.mubr.msk.f32.vlgmr.msra.gmra.mrb[0].mxu1 %vm541_vm14, %v2852_v22  ;;  %v1549_v2 = vpop.permute.xlu0 %1548 }
 0x1cb   : > { %2858 = vmatpush1.msk.msra.mxu1 %vm545_vm13, %v1332_v23  ;;  %1405 = vmatprep.mubr.f32.mxu1 %v3118_v1 }
 0x1cc   : > { %v1534_v51 = vpop.permute.xlu1 %1533 }
 0x1d2   : > { %2859 = vmatmul.mubr.msk.f32.vlgmr.msra.gmra.mrb[0].mxu1 %vm541_vm14, %v2856_v24 }
 0x1d3   : > { %2583 = vmatprep.mubr.f32.mxu1 %v3118_v1 }
 0x2a5   : > { %v1407_v26 = vpop.f32.mrb[0].mxu1 }
 0x2a6   : > { %v1420_v28 = vadd.f32 %v1418_v25, %v1407_v26  ;;  %v1409_v29 = vpop.f32.mrb[1].mxu1 }
 0x2a7   : > { %v1421_v30 = vadd.f32 %v1418_v25, %v1409_v29 }
 0x2a8   : > { %v1425_v32 = vmul.f32 %v1424_v27, %v1420_v28  ;;  %vm1422_vm0 = vcmp.gt.f32.partialorder %v1420_v28, 0.0 }
 0x2a9   : > { %vm1423_vm1 = vcmp.gt.f32.partialorder %v1421_v30, 0.0  ;;  %v1426_v34 = vmul.f32 %v1424_v27, %v1421_v30 }
 0x2aa   : > { %v1427_v38 = vsel %vm1422_vm0, %v1420_v28, %v1425_v32 }
 0x2ab   : > { %v1428_v36 = vsel %vm1423_vm1, %v1421_v30, %v1426_v34 }
 0x2ac   : > { %2860 = vmatprep.subr.msk.mxu0 %vm545_vm13, %v1428_v36  ;;  %v2200_v36 = vld [vmem:[#allocation2 + $0xc] sm:$0xf] }
 0x2ad   : > { %2861 = vmatpush1.msk.msra.mxu0 %vm545_vm13, %v1427_v38  ;;  %v2392_v38 = vld [vmem:[#allocation2 + $0xc] sm:$0xf] }
 0x2ae   : > { %2862 = vmatmul.mubr.msk.f32.vlgmr.msra.gmra.mrb[2].mxu0 %vm541_vm14, %v1429_v37 }
 0x2af   : > { %1513 = vmatprep.mubr.f32.mxu0 %v3118_v1 }
 0x2b2   : > { %2863 = vmatmul.mubr.msk.f32.gmra.mrb[4].mxu0 %vm541_vm14, %v1430_v39  ;;  %v2905_v39 = vld [vmem:[%s3721_s5 + $0x4] sm:$0xf] }
 0x2b3   : > { %1618 = vmatprep.mubr.f32.mxu0 %v3118_v1 }
 0x381   : > { %v1509_v41 = vpop.f32.mrb[2].mxu0 }
 0x382   : > { %v1511_v42 = vpop.f32.mrb[3].mxu0  ;;  %v1520_v48 = vadd.f32 %v1509_v41, %v3267_v9  ;;  %v2619_v41 = vld [vmem:[%s3725_s9] sm:$0xff] }
 0x383   : > { %v1521_v46 = vadd.f32 %v1511_v42, %v3263_v7  ;;  %v2620_v42 = vld [vmem:[%s3725_s9 + $0x8] sm:$0xff] }
 0x384   : > { %v3488_v61 = vadd.f32 %v1529_v53, %v1520_v48 }
 0x385   : > { %v1515_v47 = vpop.f32.mrb[4].mxu0  ;;  %v3484_v58 = vadd.f32 %v1529_v53, %v1521_v46 }
 0x386   : > { %v1522_v49 = vadd.f32 %v1515_v47, %v3271_v12  ;;  %v1517_v50 = vpop.f32.mrb[5].mxu0 }
 0x387   : > { %v1523_v52 = vadd.f32 %v1517_v50, %v3265_v8 }
 0x388   : > { %v3482_v55 = vadd.f32 %v1534_v51, %v1522_v49 }
 0x389   : > { %v3486_v59 = vadd.f32 %v1534_v51, %v1523_v52  ;;  %v2870_v51 = vld [vmem:[%s3720_s4 + $0x28] sm:$0xf] }
 0x38a   : > { %v2929_v63 = vpack.c.bf16 %v3482_v55, %v3488_v61 }
 0x38b   : > { %v2927_v62 = vpack.c.bf16 %v3486_v59, %v3484_v58 }
 0x38d   : > { %2928 = vmatprep.subr.bf16.mxu0 %v2927_v62 }
 0x38e   : > { %2930 = vmatpush1.bf16.msra.mxu0 %v2929_v63 }
 0x391   : > { %2868 = vmatmul.mubr.msk.f32.vlgmr.msra.gmra.mrb[6].mxu0 %vm426_vm4, %v2866_v0 }
 0x392   : > { %1727 = vmatprep.mubr.f32.mxu0 %v3118_v1 }
 0x464   : > { %v1620_v3 = vpop.f32.mrb[6].mxu0 }
 0x465   : > { %v1621_v4 = vadd.f32 %v1620_v3, %v1549_v2  ;;  %v1622_v6 = vpop.f32.mrb[7].mxu0 }
 0x466   : > { %v1623_v10 = vadd.f32 %v1622_v6, %v1549_v2 }
 0x467   : > { %vm1625_vm2 = vcmp.gt.f32.partialorder %v1621_v4, 0.0  ;;  %v1628_v13 = vmul.f32 %v1627_v31, %v1621_v4 }
 0x468   : > { %vm1626_vm3 = vcmp.gt.f32.partialorder %v1623_v10, 0.0  ;;  %v1629_v14 = vmul.f32 %v1627_v31, %v1623_v10  ;;  %v2869_v31 = vld [vmem:[%s3720_s4 + $0x24] sm:$0xf] }
 0x469   : > { %v1630_v15 = vsel %vm1625_vm2, %v1621_v4, %v1628_v13 }
 0x46a   : > { %v1631_v16 = vsel %vm1626_vm3, %v1623_v10, %v1629_v14 }
 0x46b   : > { %v3499_v17 = vcombine.low %v1630_v15, %v1631_v16 }
 0x46d   : > { %1636 = vst [vmem:[#allocation2 + $0x4] sm:$0xff] %v3499_v17  ;;  %v2201_v30 = vmul.f32 %v3499_v17, %v3339_v60  ;;  %v3033_v60 = vcombine.low %v1631_v16, %v1631_v16  ;;  %v2877_v16 = vld [vmem:[%s3720_s4 + $0x2c] sm:$0xf] }
 0x46f   : > { %v2207_v34 = vcombine.high %v2201_v30, %v2201_v30 }
 0x474   : > { %v1638_v18 = vld [vmem:[#allocation2 + $0x8] sm:$0xf]  ;;  %v1637_v19 = vld [vmem:[#allocation2] sm:$0xff] }
 0x475   : > { %1652 = vrot.lane.b32.xlu0 %v1638_v18, %s3737_s25  ;;  %v1647_v20 = vcombine.high %v1637_v19, %v1637_v19  ;;  %v1639_v21 = vmul.f32 %v1637_v19, %v3300_v35  ;;  %v1824_v23 = vld [vmem:[#allocation2 + $0x8] sm:$0xf]  ;;  %v1640_v24 = vmul.f32 %v1638_v18, %v3296_v33  ;;  %v1825_v25 = vmul.f32 %v1637_v19, %v3312_v44  ;;  %v2103_v33 = vld [vmem:[#allocation2 + $0xc] sm:$0xf] }
 0x476   : > { %v1826_v26 = vmul.f32 %v1824_v23, %v3304_v40  ;;  %v1922_v35 = vmul.f32 %v1637_v19, %v3317_v45  ;;  %v1921_v29 = vld [vmem:[#allocation2 + $0x8] sm:$0xf]  ;;  %v2104_v40 = vmul.f32 %v3499_v17, %v3334_v57  ;;  %v2105_v45 = vmul.f32 %v2103_v33, %v3326_v54  ;;  %v2297_v57 = vld [vmem:[#allocation2 + $0xc] sm:$0xf]  ;;  %v2889_v33 = vld [vmem:[%s3720_s4 + $0x38] sm:$0xf] }
 0x477   : > { %1650 = vrot.lane.b32.xlu1 %v1647_v20, %s3737_s25  ;;  %v1736_v22 = vcombine.high %v1639_v21, %v1639_v21  ;;  %v1831_v27 = vcombine.high %v1825_v25, %v1825_v25  ;;  %v1923_v44 = vmul.f32 %v1921_v29, %v3307_v43  ;;  %v2202_v43 = vmul.f32 %v2200_v36, %v3329_v56 }
 0x478   : > { %v1928_v28 = vcombine.high %v1922_v35, %v1922_v35  ;;  %v2110_v32 = vcombine.high %v2104_v40, %v2104_v40  ;;  %v2393_v54 = vmul.f32 %v3499_v17, %v3358_v11  ;;  %v2394_v56 = vmul.f32 %v2392_v38, %v3351_v5  ;;  %v2912_v11 = vld [vmem:[%s3723_s7 + $0x10] sm:$0xff]  ;;  %v2913_v5 = vld [vmem:[%s3723_s7 + $0x18] sm:$0xff]  ;;  %v2901_v38 = vld [vmem:[%s3720_s4 + $0x44] sm:$0xf] }
 0x479   : > { %1739 = vrot.lane.b32.xlu0 %v1736_v22, %s3125_s20 }
 0x47a   : > { %v2399_v37 = vcombine.high %v2393_v54, %v2393_v54 }
 0x47b   : > { %1648 = vrot.lane.b32.xlu1 %v1637_v19, %s3737_s25 }
 0x47d   : > { %1737 = vrot.lane.b32.xlu0 %v1639_v21, %s3125_s20  ;;  %v2881_v21 = vld [vmem:[%s3720_s4 + $0x30] sm:$0xf] }
 0x47f   : > { %1741 = vrot.lane.b32.xlu1 %v1640_v24, %s3125_s20  ;;  %s3743_s20 = smov 127  }
 0x481   : > { %1836 = vrot.lane.b32.xlu0 %v1826_v26, %s3741_s11 }
 0x483   : > { %1834 = vrot.lane.b32.xlu1 %v1831_v27, %s3741_s11 }
 0x485   : > { %1931 = vrot.lane.b32.xlu0 %v1928_v28, %s3742_s12 }
 0x487   : > { %1832 = vrot.lane.b32.xlu1 %v1825_v25, %s3741_s11  ;;  %s3672_s11 = scalar_lea.hbm %s3726_s10, %s2922_s21 }
 0x489   : > { %1929 = vrot.lane.b32.xlu0 %v1922_v35, %s3742_s12  ;;  %v2885_v35 = vld [vmem:[%s3720_s4 + $0x34] sm:$0xf] }
 0x48b   : > { %1933 = vrot.lane.b32.xlu1 %v1923_v44, %s3742_s12 }
 0x48d   : > { %2115 = vrot.lane.b32.xlu0 %v2105_v45, %s3743_s20 }
 0x48f   : > { %2113 = vrot.lane.b32.xlu1 %v2110_v32, %s3743_s20  ;;  %v2893_v32 = vld [vmem:[%s3720_s4 + $0x3c] sm:$0xf] }
 0x491   : > { %2210 = vrot.lane.b32.xlu0 %v2207_v34, %s3744_s18 }
 0x493   : > { %2111 = vrot.lane.b32.xlu1 %v2104_v40, %s3743_s20  ;;  %s3128_s20 = smov [#allocation6]  }
 0x495   : > { %2208 = vrot.lane.b32.xlu0 %v2201_v30, %s3744_s18 }
 0x497   : > { %2212 = vrot.lane.b32.xlu1 %v2202_v43, %s3744_s18  ;;  %s364_s18 = sand.u32 1, %s3107_s14  }
 0x498   : > { %s3674_s12 = scalar_lea.sflag [#allocation4], %s364_s18 }
 0x499   : > { %2307 = vrot.lane.b32.xlu0 %v2297_v57, %s3745_s26 }
 0x49b   : > { %2305 = vrot.lane.b32.xlu1 %v3033_v60, %s3745_s26 }
 0x49d   : > { %2402 = vrot.lane.b32.xlu0 %v2399_v37, %s3121_s30 }
 0x49f   : > { %2303 = vrot.lane.b32.xlu1 %v3499_v17, %s3745_s26  ;;  %s2865_s26 = sld [smem:[#allocation3 + $0x3]] }
 0x4a1   : > { %2400 = vrot.lane.b32.xlu0 %v2393_v54, %s3121_s30 }
 0x4a3   : > { %2404 = vrot.lane.b32.xlu1 %v2394_v56, %s3121_s30 }
 0x4a5   : > { %2605 = vperm.xlu0 %3028, %v2912_v11  }
 0x4a7   : > { %2492 = vperm.xlu1 %3029, %v2905_v39   ;;  %v2499_v39 = vstv %s2865_s26  ;;  %s2816_s26 = sshll.u32 %s364_s18, 5 }
 0x4a8   : > { %s366_s28 = scalar_lea.vmem [#allocation6], %s2816_s26  ;;  %s3053_s26 = sshll.u32 %s3128_s20, 4  ;;  %s3054_s26 = int_to_ptr.vmem [resolvable:$false] %s3053_s26 }
 0x4a9   : > { %2623 = vperm.xlu0 %3028, %v2619_v41   ;;  %s2736_s30 = sshll.u32 %s366_s28, 4  ;;  %s3055_s25 = scalar_lea.vmem %s3054_s26, 1024  ;;  %s3665_s30 = int_to_ptr.vmem [resolvable:$true] %s2736_s30 }
 0x4aa   : > { %s3049_s17 = scalar_lea.vmem %s3665_s30, 512  ;;  %p3056_p13 = scmp.lt.s32.totalorder %s3665_s30, %s3054_s26 }
 0x4ab   : > { %2610 = vperm.xlu1 %3029, %v2913_v5   ;;  %p3050_p9 = scmp.ne.s32.totalorder %s3665_s30, %s3049_s17  ;;  %p3057_p0 = scmp.lt.s32.totalorder %s3055_s25, %s3049_s17 }
 0x4ad   : > { %p3051_p10 = pnand %p3050_p9, %p3223_p5  ;;  %p3058_p1 = por %p3057_p0, %p3056_p13 }
 0x4af   : > { %2628 = vperm.xlu1 %3029, %v2620_v42   ;;  %p3052_p12 = pneg %p3051_p10 }
 0x4b1   : > { %p3059_p2 = pnand %p3058_p1, %p3052_p12 }
 0x4e7   : > { %v1653_v46 = vpop.permute.xlu0 %1652 }
 0x4e9   : > { %v1651_v47 = vpop.permute.xlu1 %1650 }
 0x4ea   : > { %v1655_v48 = vsel %vm426_vm4, %v1651_v47, %v1653_v46 }
 0x4eb   : > { %2871 = vmatprep.subr.msk.mxu0 %vm545_vm13, %v1655_v48  ;;  %v1740_v49 = vpop.permute.xlu0 %1739 }
 0x4ed   : > { %v1649_v50 = vpop.permute.xlu1 %1648 }
 0x4ee   : > { %v1654_v52 = vsel %vm426_vm4, %v1649_v50, %v1651_v47 }
 0x4ef   : > { %2872 = vmatpush1.msk.msra.mxu0 %vm545_vm13, %v1654_v52  ;;  %v1738_v53 = vpop.permute.xlu0 %1737 }
 0x4f0   : > { %2873 = vmatmul.mubr.msk.f32.vlgmr.msra.gmra.mrb[8].mxu0 %vm541_vm14, %v2870_v51  ;;  %v1743_v0 = vsel %vm630_vm12, %v1738_v53, %v1740_v49  ;;  %v2907_v51 = vld [vmem:[%s3722_s6 + $0x18] sm:$0xff] }
 0x4f1   : > { %v1742_v62 = vpop.permute.xlu1 %1741  ;;  %1816 = vmatprep.mubr.f32.mxu0 %v3118_v1 }
 0x4f2   : > { %v1744_v63 = vsel %vm630_vm12, %v1740_v49, %v1742_v62  ;;  %v2906_v49 = vld [vmem:[%s3722_s6 + $0x10] sm:$0xff] }
 0x4f3   : > { %2874 = vmatprep.subr.msk.mxu0 %vm545_vm13, %v1744_v63  ;;  %v1837_v2 = vpop.permute.xlu0 %1836 }
 0x4f4   : > { %2875 = vmatpush1.msk.msra.mxu0 %vm545_vm13, %v1743_v0 }
 0x4f5   : > { %v1835_v3 = vpop.permute.xlu1 %1834 }
 0x4f6   : > { %v1839_v4 = vsel %vm736_vm11, %v1835_v3, %v1837_v2 }
 0x4f7   : > { %2878 = vmatprep.subr.msk.mxu0 %vm545_vm13, %v1839_v4  ;;  %v1932_v6 = vpop.permute.xlu0 %1931 }
 0x4f8   : > { %2876 = vmatmul.mubr.msk.f32.vlgmr.msra.gmra.mrb[8].mxu0 %vm541_vm14, %v2869_v31 }
 0x4f9   : > { %v1833_v10 = vpop.permute.xlu1 %1832  ;;  %1911 = vmatprep.mubr.f32.mxu0 %v3118_v1 }
 0x4fa   : > { %v1838_v13 = vsel %vm736_vm11, %v1833_v10, %v1835_v3 }
 0x4fb   : > { %2879 = vmatpush1.msk.msra.mxu0 %vm545_vm13, %v1838_v13  ;;  %v1930_v14 = vpop.permute.xlu0 %1929 }
 0x4fc   : > { %v1935_v19 = vsel %vm841_vm10, %v1930_v14, %v1932_v6 }
 0x4fd   : > { %v1934_v15 = vpop.permute.xlu1 %1933 }
 0x4fe   : > { %v1936_v18 = vsel %vm841_vm10, %v1932_v6, %v1934_v15 }
 0x4ff   : > { %2882 = vmatprep.subr.msk.mxu0 %vm545_vm13, %v1936_v18  ;;  %v2116_v22 = vpop.permute.xlu0 %2115 }
 0x500   : > { %2880 = vmatmul.mubr.msk.f32.vlgmr.msra.gmra.mrb[8].mxu0 %vm541_vm14, %v2877_v16 }
 0x501   : > { %2883 = vmatpush1.msk.msra.mxu0 %vm545_vm13, %v1935_v19  ;;  %v2114_v20 = vpop.permute.xlu1 %2113  ;;  %2008 = vmatprep.mubr.f32.mxu0 %v3118_v1 }
 0x502   : > { %2886 = vmatprep.subr.msk.mxu0 %vm545_vm13, %v3033_v60  ;;  %v2118_v24 = vsel %vm824_vm9, %v2114_v20, %v2116_v22  ;;  %v2897_v60 = vld [vmem:[%s3720_s4 + $0x40] sm:$0xf] }
 0x503   : > { %v2211_v25 = vpop.permute.xlu0 %2210 }
 0x505   : > { %v2112_v23 = vpop.permute.xlu1 %2111 }
 0x506   : > { %v2117_v27 = vsel %vm824_vm9, %v2112_v23, %v2114_v20 }
 0x508   : > { %2884 = vmatmul.mubr.msk.f32.vlgmr.msra.gmra.mrb[8].mxu0 %vm541_vm14, %v2881_v21 }
 0x509   : > { %2887 = vmatpush1.msk.msra.mxu0 %vm545_vm13, %v3499_v17  ;;  %2093 = vmatprep.mubr.f32.mxu0 %v3118_v1  ;;  %v2213_v26 = vpop.permute.xlu1 %2212  ;;  %v2209_v17 = vpop.permute.xlu0 %2208 }
 0x50a   : > { %2890 = vmatprep.subr.msk.mxu0 %vm545_vm13, %v2118_v24  ;;  %v2215_v28 = vsel %vm719_vm8, %v2211_v25, %v2213_v26  ;;  %v2214_v44 = vsel %vm719_vm8, %v2209_v17, %v2211_v25 }
 0x50d   : > { %v2306_v29 = vpop.permute.xlu1 %2305  ;;  %v2308_v40 = vpop.permute.xlu0 %2307 }
 0x50e   : > { %v2310_v30 = vsel %vm1228_vm15, %v2306_v29, %v2308_v40 }
 0x510   : > { %2888 = vmatmul.mubr.msk.f32.vlgmr.msra.gmra.mrb[8].mxu0 %vm541_vm14, %v2885_v35 }
 0x511   : > { %2891 = vmatpush1.msk.msra.mxu0 %vm545_vm13, %v2117_v27  ;;  %2190 = vmatprep.mubr.f32.mxu0 %v3118_v1  ;;  %v2304_v45 = vpop.permute.xlu1 %2303  ;;  %v2403_v36 = vpop.permute.xlu0 %2402 }
 0x512   : > { %2894 = vmatprep.subr.msk.mxu0 %vm545_vm13, %v2215_v28  ;;  %v2309_v43 = vsel %vm1228_vm15, %v2304_v45, %v2306_v29 }
 0x515   : > { %v2405_v34 = vpop.permute.xlu1 %2404  ;;  %v2401_v54 = vpop.permute.xlu0 %2400 }
 0x516   : > { %v2407_v57 = vsel %vm521_vm7, %v2403_v36, %v2405_v34  ;;  %v2406_v37 = vsel %vm521_vm7, %v2401_v54, %v2403_v36 }
 0x518   : > { %2892 = vmatmul.mubr.msk.f32.vlgmr.msra.gmra.mrb[8].mxu0 %vm541_vm14, %v2889_v33 }
 0x519   : > { %2895 = vmatpush1.msk.msra.mxu0 %vm545_vm13, %v2214_v44  ;;  %2287 = vmatprep.mubr.f32.mxu0 %v3118_v1 }
 0x51a   : > { %2898 = vmatprep.subr.msk.mxu0 %vm545_vm13, %v2310_v30 }
 0x520   : > { %2896 = vmatmul.mubr.msk.f32.vlgmr.msra.gmra.mrb[8].mxu0 %vm541_vm14, %v2893_v32 }
 0x521   : > { %2899 = vmatpush1.msk.msra.mxu0 %vm545_vm13, %v2309_v43  ;;  %2382 = vmatprep.mubr.f32.mxu0 %v3118_v1 }
 0x522   : > { %2902 = vmatprep.subr.msk.mxu0 %vm545_vm13, %v2407_v57 }
 0x524   : > { %v2606_v31 = vpop.permute.xlu0 %2605 }
 0x526   : > { %v2493_v56 = vpop.permute.xlu1 %2492 }
 0x528   : > { %2900 = vmatmul.mubr.msk.f32.vlgmr.msra.gmra.mrb[8].mxu0 %vm541_vm14, %v2897_v60 }
 0x529   : > { %2903 = vmatpush1.msk.msra.mxu0 %vm545_vm13, %v2406_v37  ;;  %2479 = vmatprep.mubr.f32.mxu0 %v3118_v1 }
 0x52a   : > { %v2611_v4 = vpop.permute.xlu1 %2610 }
 0x52e   : > { %v2629_v23 = vpop.permute.xlu1 %2628 }
 0x530   : > { %2904 = vmatmul.mubr.msk.f32.vlgmr.msra.gmra.mrb[8].mxu0 %vm541_vm14, %v2901_v38 }
 0x603   : > { %v2481_v11 = vpop.f32.mrb[8].mxu0 }
 0x604   : > { %v2495_v41 = vadd.f32 %v2493_v56, %v2481_v11  ;;  %v2483_v5 = vpop.f32.mrb[9].mxu0 }
 0x605   : > { %v2496_v42 = vadd.f32 %v2493_v56, %v2483_v5 }
 0x606   : > { %v2500_v46 = vmul.f32 %v2499_v39, %v2495_v41  ;;  %vm2497_vm5 = vcmp.gt.f32.partialorder %v2495_v41, 0.0 }
 0x607   : > { %vm2498_vm6 = vcmp.gt.f32.partialorder %v2496_v42, 0.0  ;;  %v2501_v47 = vmul.f32 %v2499_v39, %v2496_v42 }
 0x608   : > { %v2502_v50 = vsel %vm2497_vm5, %v2495_v41, %v2500_v46 }
 0x609   : > { %v2503_v48 = vsel %vm2498_vm6, %v2496_v42, %v2501_v47 }
 0x60a   : > { %2908 = vmatprep.subr.msk.mxu1 %vm545_vm13, %v2503_v48 }
 0x60b   : > { %2909 = vmatpush1.msk.msra.mxu1 %vm545_vm13, %v2502_v50 }
 0x60c   : > { %2910 = vmatmul.mubr.msk.f32.vlgmr.msra.gmra.mrb[2].mxu1 %vm541_vm14, %v2906_v49 }
 0x60d   : > { %2589 = vmatprep.mubr.f32.mxu1 %v3118_v1 }
 0x610   : > { %2911 = vmatmul.mubr.msk.f32.gmra.mrb[4].mxu1 %vm541_vm14, %v2907_v51 }
 0x611   : > { %2701 = vmatprep.mubr.f32.mxu1 %v3118_v1 }
 0x6df   : > { %v2585_v52 = vpop.f32.mrb[2].mxu1 }
 0x6e0   : > { %v2587_v53 = vpop.f32.mrb[3].mxu1  ;;  %v2596_v62 = vadd.f32 %v2585_v52, %v3488_v61 }
 0x6e1   : > { %v2597_v63 = vadd.f32 %v2587_v53, %v3484_v58  ;;  %v2617_v58 = vld [vmem:[%s3724_s8] sm:$0xff] }
 0x6e2   : > { %v2613_v10 = vadd.f32 %v2606_v31, %v2596_v62 }
 0x6e3   : > { %v2591_v0 = vpop.f32.mrb[4].mxu1  ;;  %v2614_v14 = vadd.f32 %v2606_v31, %v2597_v63 }
 0x6e4   : > { %v2598_v2 = vadd.f32 %v2591_v0, %v3482_v55  ;;  %v2593_v3 = vpop.f32.mrb[5].mxu1  ;;  %v2618_v55 = vld [vmem:[%s3724_s8 + $0x8] sm:$0xff] }
 0x6e5   : > { %v2599_v6 = vadd.f32 %v2593_v3, %v3486_v59  ;;  %v2624_v59 = vpop.permute.xlu0 %2623 }
 0x6e6   : > { %v2615_v13 = vadd.f32 %v2611_v4, %v2598_v2 }
 0x6e7   : > { %v2616_v15 = vadd.f32 %v2611_v4, %v2599_v6 }
 0x6e8   : > { %v2933_v16 = vpack.c.bf16 %v2615_v13, %v2613_v10 }
 0x6e9   : > { %v2931_v18 = vpack.c.bf16 %v2616_v15, %v2614_v14 }
 0x6eb   : > { %2932 = vmatprep.subr.bf16.mxu1 %v2931_v18 }
 0x6ec   : > { %2934 = vmatpush1.bf16.msra.mxu1 %v2933_v16 }
 0x6ef   : > { %2914 = vmatmul.mubr.msk.f32.vlgmr.msra.gmra.mrb[6].mxu1 %vm426_vm4, %v2617_v58 }
 0x6f0   : > { %2707 = vmatprep.mubr.f32.mxu1 %v3118_v1 }
 0x6f3   : > { %2915 = vmatmul.mubr.msk.f32.gmra.mrb[8].mxu1 %vm426_vm4, %v2618_v55 }
 0x7c2   : > { %v2703_v61 = vpop.f32.mrb[6].mxu1 }
 0x7c3   : > { %v2704_v19 = vadd.f32 %v2703_v61, %v2624_v59  ;;  %v2705_v20 = vpop.f32.mrb[7].mxu1 }
 0x7c4   : > { %v2706_v21 = vadd.f32 %v2705_v20, %v2624_v59 }
 0x7c5   : > { %v2714_v22 = vadd.f32 %v2704_v19, %v3267_v9 }
 0x7c6   : > { %v2715_v1 = vadd.f32 %v2706_v21, %v3263_v7  ;;  %v2709_v24 = vpop.f32.mrb[8].mxu1 }
 0x7c7   : > { %2718 = vst [vmem:[%s366_s28] sm:$0xff] %v2714_v22  ;;  %v2710_v25 = vadd.f32 %v2709_v24, %v2629_v23  ;;  %v2711_v26 = vpop.f32.mrb[9].mxu1 }
 0x7c8   : > { %2719 = vst [vmem:[%s366_s28 + $0x8] sm:$0xff] %v2715_v1  ;;  %v2712_v35 = vadd.f32 %v2711_v26, %v2629_v23 }
 0x7c9   : > { %v2716_v9 = vadd.f32 %v2710_v25, %v3271_v12 }
 0x7ca   : > { %v2717_v27 = vadd.f32 %v2712_v35, %v3265_v8 }
 0x7cb   : > { %2720 = vst [vmem:[%s366_s28 + $0x10] sm:$0xff] %v2716_v9 }
 0x7cc   : > { %2721 = vst [vmem:[%s366_s28 + $0x18] sm:$0xff] %v2717_v27 }
 0x7cd   : > { %3062 = shalt.err (!%p3059_p2)
}
 0x7ce   : > { %s3063_s18 = scalar_lea.hbm %s3672_s11, 512  ;;  %s3067_s29 = scalar_lea.hbm %s3726_s10, 1024 }
 0x7cf   : > { %p3064_p3 = scmp.ne.s32.totalorder %s3672_s11, %s3063_s18  ;;  %p3068_p8 = scmp.lt.u32.totalorder %s3672_s11, %s3726_s10 }
 0x7d0   : > { %p3069_p11 = scmp.lt.u32.totalorder %s3067_s29, %s3063_s18  ;;  %p3071_p10 = scmp.lt.u32.totalorder %s3063_s18, %s3672_s11 }
 0x7d1   : > { %p3065_p4 = pnand %p3064_p3, %p3223_p5 }
 0x7d2   : > { %p3070_p9 = por %p3069_p11, %p3068_p8 }
 0x7d3   : > { %p3066_p7 = pneg %p3065_p4 }
 0x7d4   : > { %p3072_p12 = por %p3071_p10, %p3070_p9 }
 0x7d6   : > { %p3073_p13 = pnand %p3072_p12, %p3066_p7 }
 0x7d8   : > { %3076 = shalt.err (!%p3073_p13)
}
 0x7d9   : > { %s3129_s25 = smov 256   ;;  %s3746_s17 = smov 16  }
 0x7da   : > { %2971 = dma.vmem_to_hbm [thread:$0]  (%p3223_p5), %s3665_s30, 512, %s3672_s11, %s3674_s12, %s3129_s25, %s3129_s25, %s3746_s17  }
 0x7db PF: > { %p2983_p0 = scmp.ge.s32.totalorder %s3115_s16, 2  ;;  %s2751_s26 = sand.u32 1, %s3103_s13  }
 0x7dc   : > { %s2752_s18 = scalar_lea.sflag [#allocation4], %s2751_s26 }
 0x7dd   : > { %p2978_p1 = pnand %p2983_p0, %p3227_p6 }
 0x7df   : > { %3098 = dma.done.wait (!%p2978_p1), %s2752_s18, 512  }
 0x7e0   : > { %3100 = vsyncadd (!%p2978_p1), %s2752_s18, 4294966784  ;;  %p21_p2 = scmp.ge.s32.totalorder %s3210_s19, 4   ;;  %s3747_s13 = smov %s3107_s14 }
 0x7e1   : > { %s3748_s14 = smov %s3111_s15  ;;  %s3749_s15 = smov %s3221_s22 }
 0x7e2   : > { %s3750_s16 = smov %s3210_s19  ;;  %23 = sbr.rel (!%p21_p2) target bundleno = 4 (0x4), region = 122 }
 0x7e9   :  { %2757 = vsyncpa [#allocation4], 1 }
 0x7ea   :  { %2759 = vsyncpa [#allocation4 + $0x1], 1 }
 0x7eb   :  { %2760 = vsyncpa [#allocation5], 1 }
 0x7ec   :  { %2762 = vsyncpa [#allocation5 + $0x1], 1 }

</bundles_post_ra>
